<compile_context>
chip_gen: v5e
topology: v5e:2x2
jax: 0.10.0
libtpu: 0.0.40
codegen_flags: <defaults>
</compile_context>

<pallas_src>
import functools

import jax
import jax.numpy as jnp
from jax import lax
from jax.experimental import pallas as pl
from jax.experimental.pallas import tpu as pltpu  # noqa: F401  (TPU backend)


def _round_up(x, m):
    return (x + m - 1) // m * m


def _gru_decoder_kernel(gi_ref, h0_ref, whh_ref, bn_ref, wout_ref, bout_ref,
                        logp_ref, hN_ref):
    """Single-invocation GRU decoder recurrence (all operands VMEM-resident).

    gi_ref   : (S, Bp, 3*Hp) f32  input-side gate pre-activations, gate g at
                                  lanes [g*Hp, (g+1)*Hp); r/z recurrent biases
                                  already folded in.
    h0_ref   : (Bp, Hp)      f32  initial hidden state (zero-padded).
    whh_ref  : (Hp, 3*Hp)    mxu  fused, pre-transposed recurrent weights,
                                  gate slots lane-aligned.
    bn_ref   : (Bp, Hp)      f32  n-gate recurrent bias, pre-broadcast.
    wout_ref : (Hp, Op)      mxu  output linear weight, pre-transposed.
    bout_ref : (Bp, Op)      f32  output bias (+ -1e30 on padded lanes).
    logp_ref : (Bp, Op)      f32  log-softmax(out(output[0])).
    hN_ref   : (Bp, Hp)      f32  final hidden state.
    """
    S = gi_ref.shape[0]
    Hp = h0_ref.shape[1]
    mxu_dtype = whh_ref.dtype

    # Loop-invariant loads hoisted out of the recurrence.
    whh = whh_ref[...]                      # (Hp, 3*Hp)
    bn = bn_ref[...]                        # (Bp, Hp)

    def step(t, h):
        # ONE fused MXU push per timestep; gate outputs sliced at 128-lane
        # boundaries.  Elementwise gate math / hidden state stay in f32.
        gh = jnp.dot(h.astype(mxu_dtype), whh,
                     preferred_element_type=jnp.float32)          # (Bp, 3*Hp)
        gi = gi_ref[t]                                            # (Bp, 3*Hp)
        r = jax.nn.sigmoid(gi[:, 0:Hp] + gh[:, 0:Hp])
        z = jax.nn.sigmoid(gi[:, Hp:2 * Hp] + gh[:, Hp:2 * Hp])
        n = jnp.tanh(gi[:, 2 * Hp:] + r * (gh[:, 2 * Hp:] + bn))
        return (1.0 - z) * n + z * h

    # First time step: its GRU output feeds the classifier (PyTorch output[0]).
    h1 = step(0, h0_ref[...])
    logits = jnp.dot(h1.astype(mxu_dtype), wout_ref[...],
                     preferred_element_type=jnp.float32) + bout_ref[...]
    m = jnp.max(logits, axis=1, keepdims=True)
    lse = jnp.log(jnp.sum(jnp.exp(logits - m), axis=1, keepdims=True)) + m
    logp_ref[...] = logits - lse

    # Remaining time steps only advance the hidden state.
    # TODO(synk): for large S use a bounded unroll (unroll=4/8) and stream gi
    # over an "arbitrary" S grid axis instead of full residency + full unroll.
    hN_ref[...] = lax.fori_loop(1, S, step, h1, unroll=True)


@functools.partial(jax.jit, static_argnames=("mxu_dtype",))
def decoder_rnn_forward(input_ids, hidden, context, params,
                        mxu_dtype=jnp.bfloat16):
    """Mirrors DecoderRNN.forward(input, hidden, context).

    input_ids : (S, B) int32 token indices (time-major, like nn.GRU default)
    hidden    : (1, B, H) float32 initial GRU hidden state
    context   : (S, B, H) float32 context vectors
    Returns (log_probs (B, O), hidden (1, B, H), context).
    """
    S, B = input_ids.shape
    H = hidden.shape[-1]
    O = params["w_out"].shape[0]
    f32 = jnp.float32

    # Pad to hardware-native tiles (8 sublanes x 128 lanes): lane-dense loads,
    # unmasked stores, filled MXU lanes.  A few KiB at demo sizes; production
    # should keep H/O multiples of 128 and B a multiple of 8 natively.
    Bp = _round_up(max(B, 8), 8)
    Hp = _round_up(H, 128)
    Op = _round_up(O, 128)

    emb = jnp.take(params["embedding"], input_ids, axis=0)           # (S, B, H)

    # Split W_ih into embedding / context halves so concat(emb, context) is
    # never materialized; compute the input-side gate pre-activations for ALL
    # time steps at once (off the serial critical path).  Fold the r/z
    # recurrent biases in here; the n-gate recurrent bias must stay inside the
    # r*(...) term in the kernel.
    w_ih_emb_t = params["w_ih"][:, :H].T.astype(mxu_dtype)           # (H, 3H)
    w_ih_ctx_t = params["w_ih"][:, H:].T.astype(mxu_dtype)           # (H, 3H)
    b_fold = (params["b_ih"]
              + jnp.concatenate([params["b_hh"][:2 * H],
                                 jnp.zeros((H,), params["b_hh"].dtype)])
              ).astype(f32)
    gi = (jnp.dot(emb.reshape(S * B, H).astype(mxu_dtype), w_ih_emb_t,
                  preferred_element_type=f32)
          + jnp.dot(context.reshape(S * B, H).astype(mxu_dtype), w_ih_ctx_t,
                    preferred_element_type=f32)
          + b_fold[None, :])                                          # (S*B, 3H)
    # Lay out as (S, Bp, 3*Hp) with gate g in its own 128-lane-aligned slot.
    # One zero-pad pass, no transpose through HBM (none needed when H%128==0).
    gi = gi.reshape(S, B, 3, H)
    gi = jnp.pad(gi, ((0, 0), (0, Bp - B), (0, 0), (0, Hp - H)))
    gi = gi.reshape(S, Bp, 3 * Hp)

    # Fused recurrent weight: (Hp, 3*Hp), pre-transposed, gate-major along
    # lanes -> ONE MXU push per timestep instead of three.
    whh_t = jnp.transpose(params["w_hh"].reshape(3, H, H), (0, 2, 1))  # (3,H,H)
    whh_t = jnp.pad(whh_t, ((0, 0), (0, Hp - H), (0, Hp - H)))         # (3,Hp,Hp)
    whh_packed = (jnp.transpose(whh_t, (1, 0, 2))
                  .reshape(Hp, 3 * Hp).astype(mxu_dtype))

    # n-gate recurrent bias, pre-broadcast once (avoids per-step broadcasts).
    bn = jnp.broadcast_to(
        jnp.pad(params["b_hh"][2 * H:], (0, Hp - H)).astype(f32)[None, :],
        (Bp, Hp))

    wout_t = jnp.pad(params["w_out"].T,
                     ((0, Hp - H), (0, Op - O))).astype(mxu_dtype)     # (Hp, Op)
    # Padded output lanes get -1e30 so the in-kernel log-softmax ignores them.
    bout = jnp.pad(params["b_out"].astype(f32), (0, Op - O))
    bout = bout + jnp.where(jnp.arange(Op) < O, 0.0, -1e30).astype(f32)
    bout = jnp.broadcast_to(bout[None, :], (Bp, Op))

    h0 = jnp.pad(hidden[0].astype(f32), ((0, Bp - B), (0, Hp - H)))

    logp_pad, h_pad = pl.pallas_call(
        _gru_decoder_kernel,
        out_shape=(
            jax.ShapeDtypeStruct((Bp, Op), f32),
            jax.ShapeDtypeStruct((Bp, Hp), f32),
        ),
    )(gi, h0, whh_packed, bn, wout_t, bout)

    return logp_pad[:B, :O], h_pad[:B, :H][None], context


def _ref_forward(input_ids, hidden, context, params):
    """Pure-JAX reference mirroring PyTorch GRU gate equations."""
    emb = jnp.take(params["embedding"], input_ids, axis=0)
    x = jnp.concatenate([emb, context], axis=2)
    H = hidden.shape[-1]
    h = hidden[0]
    first_out = None
    for t in range(x.shape[0]):
        gi = x[t] @ params["w_ih"].T + params["b_ih"]
        gh = h @ params["w_hh"].T + params["b_hh"]
        r = jax.nn.sigmoid(gi[:, :H] + gh[:, :H])
        z = jax.nn.sigmoid(gi[:, H:2 * H] + gh[:, H:2 * H])
        n = jnp.tanh(gi[:, 2 * H:] + r * gh[:, 2 * H:])
        h = (1.0 - z) * n + z * h
        if t == 0:
            first_out = h
    logits = first_out @ params["w_out"].T + params["b_out"]
    logp = logits - jax.scipy.special.logsumexp(logits, axis=1, keepdims=True)
    return logp, h[None], context


def init_params(key, hidden_size, output_size):
    H, O = hidden_size, output_size
    IN = 2 * H  # embedding (H) concatenated with context (H)
    ks = jax.random.split(key, 7)
    bound = 1.0 / jnp.sqrt(H)
    u = lambda k, shape: jax.random.uniform(k, shape, jnp.float32, -bound, bound)
    return {
        "embedding": jax.random.normal(ks[0], (O, H), jnp.float32),
        "w_ih": u(ks[1], (3 * H, IN)),
        "w_hh": u(ks[2], (3 * H, H)),
        "b_ih": u(ks[3], (3 * H,)),
        "b_hh": u(ks[4], (3 * H,)),
        "w_out": u(ks[5], (O, H)),
        "b_out": u(ks[6], (O,)),
    }


if __name__ == "__main__":
    hidden_size = 32
    output_size = 16
    seq_len = 8
    batch = 4

    key = jax.random.PRNGKey(0)
    k_par, k_ids, k_ctx = jax.random.split(key, 3)

    params = init_params(k_par, hidden_size, output_size)
    input_ids = jax.random.randint(k_ids, (seq_len, batch), 0, output_size, jnp.int32)
    hidden0 = jnp.zeros((1, batch, hidden_size), jnp.float32)   # initHidden equivalent
    context = jax.random.normal(k_ctx, (seq_len, batch, hidden_size), jnp.float32)

    logp_ref, h_ref, _ = _ref_forward(input_ids, hidden0, context, params)

    # f32 MXU-operand path (tolerance covers TPU default matmul precision).
    logp, h_final, ctx_out = decoder_rnn_forward(
        input_ids, hidden0, context, params, mxu_dtype=jnp.float32)
    jax.block_until_ready((logp, h_final, ctx_out))
    assert logp.shape == (batch, output_size) and h_final.shape == hidden0.shape
    assert jnp.allclose(logp, logp_ref, rtol=2e-2, atol=2e-2), "f32 log-softmax mismatch"
    assert jnp.allclose(h_final, h_ref, rtol=2e-2, atol=2e-2), "f32 hidden mismatch"

    # Default path: bf16 MXU operands, f32 accumulation + f32 elementwise/state.
    logp_bf, h_bf, _ = decoder_rnn_forward(input_ids, hidden0, context, params)
    jax.block_until_ready((logp_bf, h_bf))
    assert jnp.allclose(logp_bf, logp_ref, rtol=1e-1, atol=1e-1), "bf16 log-softmax mismatch"
    assert jnp.allclose(h_bf, h_ref, rtol=1e-1, atol=1e-1), "bf16 hidden mismatch"

    print("KERNEL_OK")
</pallas_src>

<mosaic_0001>
module attributes {stable_mosaic.version = 11 : i64} {
  func.func @_gru_decoder_kernel(%arg0: memref<8x8x384xf32, #tpu.memory_space<vmem>>, %arg1: memref<8x128xf32, #tpu.memory_space<vmem>>, %arg2: memref<128x384xf32, #tpu.memory_space<vmem>>, %arg3: memref<8x128xf32, #tpu.memory_space<vmem>>, %arg4: memref<128x128xf32, #tpu.memory_space<vmem>>, %arg5: memref<8x128xf32, #tpu.memory_space<vmem>>, %arg6: memref<8x128xf32, #tpu.memory_space<vmem>>, %arg7: memref<8x128xf32, #tpu.memory_space<vmem>>) attributes {dimension_semantics = [], scalar_prefetch = 0 : i64, scratch_operands = 0 : i64, tpu.core_type = #tpu.core_type<tc>} {
    %c0 = arith.constant 0 : index
    %c0_0 = arith.constant 0 : index
    %0 = vector.load %arg2[%c0, %c0_0] : memref<128x384xf32, #tpu.memory_space<vmem>>, vector<128x384xf32>
    %c0_1 = arith.constant 0 : index
    %c0_2 = arith.constant 0 : index
    %1 = vector.load %arg3[%c0_1, %c0_2] : memref<8x128xf32, #tpu.memory_space<vmem>>, vector<8x128xf32>
    %c0_3 = arith.constant 0 : index
    %c0_4 = arith.constant 0 : index
    %2 = vector.load %arg1[%c0_3, %c0_4] : memref<8x128xf32, #tpu.memory_space<vmem>>, vector<8x128xf32>
    %cst = arith.constant dense<0.000000e+00> : vector<8x384xf32>
    %3 = tpu.matmul %2, %0, %cst {dimension_numbers = #tpu.dot_dimension_numbers<[1], [0], [0], [1], [0, 0, 1, 1], [], []>} : vector<8x128xf32>, vector<128x384xf32>, vector<8x384xf32> -> vector<8x384xf32>
    %c0_5 = arith.constant 0 : index
    %c0_6 = arith.constant 0 : index
    %c0_7 = arith.constant 0 : index
    %4 = vector.load %arg0[%c0_5, %c0_6, %c0_7] : memref<8x8x384xf32, #tpu.memory_space<vmem>>, vector<1x8x384xf32>
    %5 = vector.shape_cast %4 : vector<1x8x384xf32> to vector<8x384xf32>
    %6 = vector.extract_strided_slice %5 {offsets = [0, 0], sizes = [8, 128], strides = [1, 1]} : vector<8x384xf32> to vector<8x128xf32>
    %7 = vector.extract_strided_slice %3 {offsets = [0, 0], sizes = [8, 128], strides = [1, 1]} : vector<8x384xf32> to vector<8x128xf32>
    %8 = arith.addf %6, %7 : vector<8x128xf32>
    %9 = arith.negf %8 : vector<8x128xf32>
    %10 = math.exp %9 : vector<8x128xf32>
    %cst_8 = arith.constant 1.000000e+00 : f32
    %11 = vector.broadcast %cst_8 : f32 to vector<8x128xf32>
    %12 = arith.addf %11, %10 : vector<8x128xf32>
    %13 = arith.divf %11, %12 : vector<8x128xf32>
    %14 = vector.extract_strided_slice %5 {offsets = [0, 128], sizes = [8, 128], strides = [1, 1]} : vector<8x384xf32> to vector<8x128xf32>
    %15 = vector.extract_strided_slice %3 {offsets = [0, 128], sizes = [8, 128], strides = [1, 1]} : vector<8x384xf32> to vector<8x128xf32>
    %16 = arith.addf %14, %15 : vector<8x128xf32>
    %17 = arith.negf %16 : vector<8x128xf32>
    %18 = math.exp %17 : vector<8x128xf32>
    %cst_9 = arith.constant 1.000000e+00 : f32
    %19 = vector.broadcast %cst_9 : f32 to vector<8x128xf32>
    %20 = arith.addf %19, %18 : vector<8x128xf32>
    %21 = arith.divf %19, %20 : vector<8x128xf32>
    %22 = vector.extract_strided_slice %5 {offsets = [0, 256], sizes = [8, 128], strides = [1, 1]} : vector<8x384xf32> to vector<8x128xf32>
    %23 = vector.extract_strided_slice %3 {offsets = [0, 256], sizes = [8, 128], strides = [1, 1]} : vector<8x384xf32> to vector<8x128xf32>
    %24 = arith.addf %23, %1 : vector<8x128xf32>
    %25 = arith.mulf %13, %24 : vector<8x128xf32>
    %26 = arith.addf %22, %25 : vector<8x128xf32>
    %27 = math.tanh %26 : vector<8x128xf32>
    %cst_10 = arith.constant 1.000000e+00 : f32
    %28 = vector.broadcast %cst_10 : f32 to vector<8x128xf32>
    %29 = arith.subf %28, %21 : vector<8x128xf32>
    %30 = arith.mulf %29, %27 : vector<8x128xf32>
    %31 = arith.mulf %21, %2 : vector<8x128xf32>
    %32 = arith.addf %30, %31 : vector<8x128xf32>
    %c0_11 = arith.constant 0 : index
    %c0_12 = arith.constant 0 : index
    %33 = vector.load %arg4[%c0_11, %c0_12] : memref<128x128xf32, #tpu.memory_space<vmem>>, vector<128x128xf32>
    %cst_13 = arith.constant dense<0.000000e+00> : vector<8x128xf32>
    %34 = tpu.matmul %32, %33, %cst_13 {dimension_numbers = #tpu.dot_dimension_numbers<[1], [0], [0], [1], [0, 0, 1, 1], [], []>} : vector<8x128xf32>, vector<128x128xf32>, vector<8x128xf32> -> vector<8x128xf32>
    %c0_14 = arith.constant 0 : index
    %c0_15 = arith.constant 0 : index
    %35 = vector.load %arg5[%c0_14, %c0_15] : memref<8x128xf32, #tpu.memory_space<vmem>>, vector<8x128xf32>
    %36 = arith.addf %34, %35 : vector<8x128xf32>
    %cst_16 = arith.constant dense<0xFF800000> : vector<8xf32>
    %37 = vector.multi_reduction <maximumf>, %36, %cst_16 [1] : vector<8x128xf32> to vector<8xf32>
    %38 = vector.shape_cast %37 : vector<8xf32> to vector<8x1xf32>
    %39 = vector.broadcast %38 : vector<8x1xf32> to vector<8x128xf32>
    %40 = arith.subf %36, %39 : vector<8x128xf32>
    %41 = math.exp %40 : vector<8x128xf32>
    %cst_17 = arith.constant dense<0.000000e+00> : vector<8xf32>
    %42 = vector.multi_reduction <add>, %41, %cst_17 [1] : vector<8x128xf32> to vector<8xf32>
    %43 = vector.shape_cast %42 : vector<8xf32> to vector<8x1xf32>
    %44 = math.log %43 : vector<8x1xf32>
    %45 = arith.addf %44, %38 : vector<8x1xf32>
    %46 = vector.broadcast %45 : vector<8x1xf32> to vector<8x128xf32>
    %47 = arith.subf %36, %46 : vector<8x128xf32>
    %c0_18 = arith.constant 0 : index
    %c0_19 = arith.constant 0 : index
    %48 = vector.load %arg6[%c0_18, %c0_19] : memref<8x128xf32, #tpu.memory_space<vmem>>, vector<8x128xf32>
    tpu.vector_store %arg6[%c0_18, %c0_19], %47 {strides = array<i32>} : memref<8x128xf32, #tpu.memory_space<vmem>>, vector<8x128xf32>,
    %c1_i32 = arith.constant 1 : i32
    %cst_20 = arith.constant dense<0.000000e+00> : vector<8x384xf32>
    %49 = tpu.matmul %32, %0, %cst_20 {dimension_numbers = #tpu.dot_dimension_numbers<[1], [0], [0], [1], [0, 0, 1, 1], [], []>} : vector<8x128xf32>, vector<128x384xf32>, vector<8x384xf32> -> vector<8x384xf32>
    %50 = arith.index_cast %c1_i32 : i32 to index
    %c0_21 = arith.constant 0 : index
    %c0_22 = arith.constant 0 : index
    %51 = vector.load %arg0[%50, %c0_21, %c0_22] : memref<8x8x384xf32, #tpu.memory_space<vmem>>, vector<1x8x384xf32>
    %52 = vector.shape_cast %51 : vector<1x8x384xf32> to vector<8x384xf32>
    %53 = vector.extract_strided_slice %52 {offsets = [0, 0], sizes = [8, 128], strides = [1, 1]} : vector<8x384xf32> to vector<8x128xf32>
    %54 = vector.extract_strided_slice %49 {offsets = [0, 0], sizes = [8, 128], strides = [1, 1]} : vector<8x384xf32> to vector<8x128xf32>
    %55 = arith.addf %53, %54 : vector<8x128xf32>
    %56 = arith.negf %55 : vector<8x128xf32>
    %57 = math.exp %56 : vector<8x128xf32>
    %cst_23 = arith.constant 1.000000e+00 : f32
    %58 = vector.broadcast %cst_23 : f32 to vector<8x128xf32>
    %59 = arith.addf %58, %57 : vector<8x128xf32>
    %60 = arith.divf %58, %59 : vector<8x128xf32>
    %61 = vector.extract_strided_slice %52 {offsets = [0, 128], sizes = [8, 128], strides = [1, 1]} : vector<8x384xf32> to vector<8x128xf32>
    %62 = vector.extract_strided_slice %49 {offsets = [0, 128], sizes = [8, 128], strides = [1, 1]} : vector<8x384xf32> to vector<8x128xf32>
    %63 = arith.addf %61, %62 : vector<8x128xf32>
    %64 = arith.negf %63 : vector<8x128xf32>
    %65 = math.exp %64 : vector<8x128xf32>
    %cst_24 = arith.constant 1.000000e+00 : f32
    %66 = vector.broadcast %cst_24 : f32 to vector<8x128xf32>
    %67 = arith.addf %66, %65 : vector<8x128xf32>
    %68 = arith.divf %66, %67 : vector<8x128xf32>
    %69 = vector.extract_strided_slice %52 {offsets = [0, 256], sizes = [8, 128], strides = [1, 1]} : vector<8x384xf32> to vector<8x128xf32>
    %70 = vector.extract_strided_slice %49 {offsets = [0, 256], sizes = [8, 128], strides = [1, 1]} : vector<8x384xf32> to vector<8x128xf32>
    %71 = arith.addf %70, %1 : vector<8x128xf32>
    %72 = arith.mulf %60, %71 : vector<8x128xf32>
    %73 = arith.addf %69, %72 : vector<8x128xf32>
    %74 = math.tanh %73 : vector<8x128xf32>
    %cst_25 = arith.constant 1.000000e+00 : f32
    %75 = vector.broadcast %cst_25 : f32 to vector<8x128xf32>
    %76 = arith.subf %75, %68 : vector<8x128xf32>
    %77 = arith.mulf %76, %74 : vector<8x128xf32>
    %78 = arith.mulf %68, %32 : vector<8x128xf32>
    %79 = arith.addf %77, %78 : vector<8x128xf32>
    %c2_i32 = arith.constant 2 : i32
    %cst_26 = arith.constant dense<0.000000e+00> : vector<8x384xf32>
    %80 = tpu.matmul %79, %0, %cst_26 {dimension_numbers = #tpu.dot_dimension_numbers<[1], [0], [0], [1], [0, 0, 1, 1], [], []>} : vector<8x128xf32>, vector<128x384xf32>, vector<8x384xf32> -> vector<8x384xf32>
    %81 = arith.index_cast %c2_i32 : i32 to index
    %c0_27 = arith.constant 0 : index
    %c0_28 = arith.constant 0 : index
    %82 = vector.load %arg0[%81, %c0_27, %c0_28] : memref<8x8x384xf32, #tpu.memory_space<vmem>>, vector<1x8x384xf32>
    %83 = vector.shape_cast %82 : vector<1x8x384xf32> to vector<8x384xf32>
    %84 = vector.extract_strided_slice %83 {offsets = [0, 0], sizes = [8, 128], strides = [1, 1]} : vector<8x384xf32> to vector<8x128xf32>
    %85 = vector.extract_strided_slice %80 {offsets = [0, 0], sizes = [8, 128], strides = [1, 1]} : vector<8x384xf32> to vector<8x128xf32>
    %86 = arith.addf %84, %85 : vector<8x128xf32>
    %87 = arith.negf %86 : vector<8x128xf32>
    %88 = math.exp %87 : vector<8x128xf32>
    %cst_29 = arith.constant 1.000000e+00 : f32
    %89 = vector.broadcast %cst_29 : f32 to vector<8x128xf32>
    %90 = arith.addf %89, %88 : vector<8x128xf32>
    %91 = arith.divf %89, %90 : vector<8x128xf32>
    %92 = vector.extract_strided_slice %83 {offsets = [0, 128], sizes = [8, 128], strides = [1, 1]} : vector<8x384xf32> to vector<8x128xf32>
    %93 = vector.extract_strided_slice %80 {offsets = [0, 128], sizes = [8, 128], strides = [1, 1]} : vector<8x384xf32> to vector<8x128xf32>
    %94 = arith.addf %92, %93 : vector<8x128xf32>
    %95 = arith.negf %94 : vector<8x128xf32>
    %96 = math.exp %95 : vector<8x128xf32>
    %cst_30 = arith.constant 1.000000e+00 : f32
    %97 = vector.broadcast %cst_30 : f32 to vector<8x128xf32>
    %98 = arith.addf %97, %96 : vector<8x128xf32>
    %99 = arith.divf %97, %98 : vector<8x128xf32>
    %100 = vector.extract_strided_slice %83 {offsets = [0, 256], sizes = [8, 128], strides = [1, 1]} : vector<8x384xf32> to vector<8x128xf32>
    %101 = vector.extract_strided_slice %80 {offsets = [0, 256], sizes = [8, 128], strides = [1, 1]} : vector<8x384xf32> to vector<8x128xf32>
    %102 = arith.addf %101, %1 : vector<8x128xf32>
    %103 = arith.mulf %91, %102 : vector<8x128xf32>
    %104 = arith.addf %100, %103 : vector<8x128xf32>
    %105 = math.tanh %104 : vector<8x128xf32>
    %cst_31 = arith.constant 1.000000e+00 : f32
    %106 = vector.broadcast %cst_31 : f32 to vector<8x128xf32>
    %107 = arith.subf %106, %99 : vector<8x128xf32>
    %108 = arith.mulf %107, %105 : vector<8x128xf32>
    %109 = arith.mulf %99, %79 : vector<8x128xf32>
    %110 = arith.addf %108, %109 : vector<8x128xf32>
    %c3_i32 = arith.constant 3 : i32
    %cst_32 = arith.constant dense<0.000000e+00> : vector<8x384xf32>
    %111 = tpu.matmul %110, %0, %cst_32 {dimension_numbers = #tpu.dot_dimension_numbers<[1], [0], [0], [1], [0, 0, 1, 1], [], []>} : vector<8x128xf32>, vector<128x384xf32>, vector<8x384xf32> -> vector<8x384xf32>
    %112 = arith.index_cast %c3_i32 : i32 to index
    %c0_33 = arith.constant 0 : index
    %c0_34 = arith.constant 0 : index
    %113 = vector.load %arg0[%112, %c0_33, %c0_34] : memref<8x8x384xf32, #tpu.memory_space<vmem>>, vector<1x8x384xf32>
    %114 = vector.shape_cast %113 : vector<1x8x384xf32> to vector<8x384xf32>
    %115 = vector.extract_strided_slice %114 {offsets = [0, 0], sizes = [8, 128], strides = [1, 1]} : vector<8x384xf32> to vector<8x128xf32>
    %116 = vector.extract_strided_slice %111 {offsets = [0, 0], sizes = [8, 128], strides = [1, 1]} : vector<8x384xf32> to vector<8x128xf32>
    %117 = arith.addf %115, %116 : vector<8x128xf32>
    %118 = arith.negf %117 : vector<8x128xf32>
    %119 = math.exp %118 : vector<8x128xf32>
    %cst_35 = arith.constant 1.000000e+00 : f32
    %120 = vector.broadcast %cst_35 : f32 to vector<8x128xf32>
    %121 = arith.addf %120, %119 : vector<8x128xf32>
    %122 = arith.divf %120, %121 : vector<8x128xf32>
    %123 = vector.extract_strided_slice %114 {offsets = [0, 128], sizes = [8, 128], strides = [1, 1]} : vector<8x384xf32> to vector<8x128xf32>
    %124 = vector.extract_strided_slice %111 {offsets = [0, 128], sizes = [8, 128], strides = [1, 1]} : vector<8x384xf32> to vector<8x128xf32>
    %125 = arith.addf %123, %124 : vector<8x128xf32>
    %126 = arith.negf %125 : vector<8x128xf32>
    %127 = math.exp %126 : vector<8x128xf32>
    %cst_36 = arith.constant 1.000000e+00 : f32
    %128 = vector.broadcast %cst_36 : f32 to vector<8x128xf32>
    %129 = arith.addf %128, %127 : vector<8x128xf32>
    %130 = arith.divf %128, %129 : vector<8x128xf32>
    %131 = vector.extract_strided_slice %114 {offsets = [0, 256], sizes = [8, 128], strides = [1, 1]} : vector<8x384xf32> to vector<8x128xf32>
    %132 = vector.extract_strided_slice %111 {offsets = [0, 256], sizes = [8, 128], strides = [1, 1]} : vector<8x384xf32> to vector<8x128xf32>
    %133 = arith.addf %132, %1 : vector<8x128xf32>
    %134 = arith.mulf %122, %133 : vector<8x128xf32>
    %135 = arith.addf %131, %134 : vector<8x128xf32>
    %136 = math.tanh %135 : vector<8x128xf32>
    %cst_37 = arith.constant 1.000000e+00 : f32
    %137 = vector.broadcast %cst_37 : f32 to vector<8x128xf32>
    %138 = arith.subf %137, %130 : vector<8x128xf32>
    %139 = arith.mulf %138, %136 : vector<8x128xf32>
    %140 = arith.mulf %130, %110 : vector<8x128xf32>
    %141 = arith.addf %139, %140 : vector<8x128xf32>
    %c4_i32 = arith.constant 4 : i32
    %cst_38 = arith.constant dense<0.000000e+00> : vector<8x384xf32>
    %142 = tpu.matmul %141, %0, %cst_38 {dimension_numbers = #tpu.dot_dimension_numbers<[1], [0], [0], [1], [0, 0, 1, 1], [], []>} : vector<8x128xf32>, vector<128x384xf32>, vector<8x384xf32> -> vector<8x384xf32>
    %143 = arith.index_cast %c4_i32 : i32 to index
    %c0_39 = arith.constant 0 : index
    %c0_40 = arith.constant 0 : index
    %144 = vector.load %arg0[%143, %c0_39, %c0_40] : memref<8x8x384xf32, #tpu.memory_space<vmem>>, vector<1x8x384xf32>
    %145 = vector.shape_cast %144 : vector<1x8x384xf32> to vector<8x384xf32>
    %146 = vector.extract_strided_slice %145 {offsets = [0, 0], sizes = [8, 128], strides = [1, 1]} : vector<8x384xf32> to vector<8x128xf32>
    %147 = vector.extract_strided_slice %142 {offsets = [0, 0], sizes = [8, 128], strides = [1, 1]} : vector<8x384xf32> to vector<8x128xf32>
    %148 = arith.addf %146, %147 : vector<8x128xf32>
    %149 = arith.negf %148 : vector<8x128xf32>
    %150 = math.exp %149 : vector<8x128xf32>
    %cst_41 = arith.constant 1.000000e+00 : f32
    %151 = vector.broadcast %cst_41 : f32 to vector<8x128xf32>
    %152 = arith.addf %151, %150 : vector<8x128xf32>
    %153 = arith.divf %151, %152 : vector<8x128xf32>
    %154 = vector.extract_strided_slice %145 {offsets = [0, 128], sizes = [8, 128], strides = [1, 1]} : vector<8x384xf32> to vector<8x128xf32>
    %155 = vector.extract_strided_slice %142 {offsets = [0, 128], sizes = [8, 128], strides = [1, 1]} : vector<8x384xf32> to vector<8x128xf32>
    %156 = arith.addf %154, %155 : vector<8x128xf32>
    %157 = arith.negf %156 : vector<8x128xf32>
    %158 = math.exp %157 : vector<8x128xf32>
    %cst_42 = arith.constant 1.000000e+00 : f32
    %159 = vector.broadcast %cst_42 : f32 to vector<8x128xf32>
    %160 = arith.addf %159, %158 : vector<8x128xf32>
    %161 = arith.divf %159, %160 : vector<8x128xf32>
    %162 = vector.extract_strided_slice %145 {offsets = [0, 256], sizes = [8, 128], strides = [1, 1]} : vector<8x384xf32> to vector<8x128xf32>
    %163 = vector.extract_strided_slice %142 {offsets = [0, 256], sizes = [8, 128], strides = [1, 1]} : vector<8x384xf32> to vector<8x128xf32>
    %164 = arith.addf %163, %1 : vector<8x128xf32>
    %165 = arith.mulf %153, %164 : vector<8x128xf32>
    %166 = arith.addf %162, %165 : vector<8x128xf32>
    %167 = math.tanh %166 : vector<8x128xf32>
    %cst_43 = arith.constant 1.000000e+00 : f32
    %168 = vector.broadcast %cst_43 : f32 to vector<8x128xf32>
    %169 = arith.subf %168, %161 : vector<8x128xf32>
    %170 = arith.mulf %169, %167 : vector<8x128xf32>
    %171 = arith.mulf %161, %141 : vector<8x128xf32>
    %172 = arith.addf %170, %171 : vector<8x128xf32>
    %c5_i32 = arith.constant 5 : i32
    %cst_44 = arith.constant dense<0.000000e+00> : vector<8x384xf32>
    %173 = tpu.matmul %172, %0, %cst_44 {dimension_numbers = #tpu.dot_dimension_numbers<[1], [0], [0], [1], [0, 0, 1, 1], [], []>} : vector<8x128xf32>, vector<128x384xf32>, vector<8x384xf32> -> vector<8x384xf32>
    %174 = arith.index_cast %c5_i32 : i32 to index
    %c0_45 = arith.constant 0 : index
    %c0_46 = arith.constant 0 : index
    %175 = vector.load %arg0[%174, %c0_45, %c0_46] : memref<8x8x384xf32, #tpu.memory_space<vmem>>, vector<1x8x384xf32>
    %176 = vector.shape_cast %175 : vector<1x8x384xf32> to vector<8x384xf32>
    %177 = vector.extract_strided_slice %176 {offsets = [0, 0], sizes = [8, 128], strides = [1, 1]} : vector<8x384xf32> to vector<8x128xf32>
    %178 = vector.extract_strided_slice %173 {offsets = [0, 0], sizes = [8, 128], strides = [1, 1]} : vector<8x384xf32> to vector<8x128xf32>
    %179 = arith.addf %177, %178 : vector<8x128xf32>
    %180 = arith.negf %179 : vector<8x128xf32>
    %181 = math.exp %180 : vector<8x128xf32>
    %cst_47 = arith.constant 1.000000e+00 : f32
    %182 = vector.broadcast %cst_47 : f32 to vector<8x128xf32>
    %183 = arith.addf %182, %181 : vector<8x128xf32>
    %184 = arith.divf %182, %183 : vector<8x128xf32>
    %185 = vector.extract_strided_slice %176 {offsets = [0, 128], sizes = [8, 128], strides = [1, 1]} : vector<8x384xf32> to vector<8x128xf32>
    %186 = vector.extract_strided_slice %173 {offsets = [0, 128], sizes = [8, 128], strides = [1, 1]} : vector<8x384xf32> to vector<8x128xf32>
    %187 = arith.addf %185, %186 : vector<8x128xf32>
    %188 = arith.negf %187 : vector<8x128xf32>
    %189 = math.exp %188 : vector<8x128xf32>
    %cst_48 = arith.constant 1.000000e+00 : f32
    %190 = vector.broadcast %cst_48 : f32 to vector<8x128xf32>
    %191 = arith.addf %190, %189 : vector<8x128xf32>
    %192 = arith.divf %190, %191 : vector<8x128xf32>
    %193 = vector.extract_strided_slice %176 {offsets = [0, 256], sizes = [8, 128], strides = [1, 1]} : vector<8x384xf32> to vector<8x128xf32>
    %194 = vector.extract_strided_slice %173 {offsets = [0, 256], sizes = [8, 128], strides = [1, 1]} : vector<8x384xf32> to vector<8x128xf32>
    %195 = arith.addf %194, %1 : vector<8x128xf32>
    %196 = arith.mulf %184, %195 : vector<8x128xf32>
    %197 = arith.addf %193, %196 : vector<8x128xf32>
    %198 = math.tanh %197 : vector<8x128xf32>
    %cst_49 = arith.constant 1.000000e+00 : f32
    %199 = vector.broadcast %cst_49 : f32 to vector<8x128xf32>
    %200 = arith.subf %199, %192 : vector<8x128xf32>
    %201 = arith.mulf %200, %198 : vector<8x128xf32>
    %202 = arith.mulf %192, %172 : vector<8x128xf32>
    %203 = arith.addf %201, %202 : vector<8x128xf32>
    %c6_i32 = arith.constant 6 : i32
    %cst_50 = arith.constant dense<0.000000e+00> : vector<8x384xf32>
    %204 = tpu.matmul %203, %0, %cst_50 {dimension_numbers = #tpu.dot_dimension_numbers<[1], [0], [0], [1], [0, 0, 1, 1], [], []>} : vector<8x128xf32>, vector<128x384xf32>, vector<8x384xf32> -> vector<8x384xf32>
    %205 = arith.index_cast %c6_i32 : i32 to index
    %c0_51 = arith.constant 0 : index
    %c0_52 = arith.constant 0 : index
    %206 = vector.load %arg0[%205, %c0_51, %c0_52] : memref<8x8x384xf32, #tpu.memory_space<vmem>>, vector<1x8x384xf32>
    %207 = vector.shape_cast %206 : vector<1x8x384xf32> to vector<8x384xf32>
    %208 = vector.extract_strided_slice %207 {offsets = [0, 0], sizes = [8, 128], strides = [1, 1]} : vector<8x384xf32> to vector<8x128xf32>
    %209 = vector.extract_strided_slice %204 {offsets = [0, 0], sizes = [8, 128], strides = [1, 1]} : vector<8x384xf32> to vector<8x128xf32>
    %210 = arith.addf %208, %209 : vector<8x128xf32>
    %211 = arith.negf %210 : vector<8x128xf32>
    %212 = math.exp %211 : vector<8x128xf32>
    %cst_53 = arith.constant 1.000000e+00 : f32
    %213 = vector.broadcast %cst_53 : f32 to vector<8x128xf32>
    %214 = arith.addf %213, %212 : vector<8x128xf32>
    %215 = arith.divf %213, %214 : vector<8x128xf32>
    %216 = vector.extract_strided_slice %207 {offsets = [0, 128], sizes = [8, 128], strides = [1, 1]} : vector<8x384xf32> to vector<8x128xf32>
    %217 = vector.extract_strided_slice %204 {offsets = [0, 128], sizes = [8, 128], strides = [1, 1]} : vector<8x384xf32> to vector<8x128xf32>
    %218 = arith.addf %216, %217 : vector<8x128xf32>
    %219 = arith.negf %218 : vector<8x128xf32>
    %220 = math.exp %219 : vector<8x128xf32>
    %cst_54 = arith.constant 1.000000e+00 : f32
    %221 = vector.broadcast %cst_54 : f32 to vector<8x128xf32>
    %222 = arith.addf %221, %220 : vector<8x128xf32>
    %223 = arith.divf %221, %222 : vector<8x128xf32>
    %224 = vector.extract_strided_slice %207 {offsets = [0, 256], sizes = [8, 128], strides = [1, 1]} : vector<8x384xf32> to vector<8x128xf32>
    %225 = vector.extract_strided_slice %204 {offsets = [0, 256], sizes = [8, 128], strides = [1, 1]} : vector<8x384xf32> to vector<8x128xf32>
    %226 = arith.addf %225, %1 : vector<8x128xf32>
    %227 = arith.mulf %215, %226 : vector<8x128xf32>
    %228 = arith.addf %224, %227 : vector<8x128xf32>
    %229 = math.tanh %228 : vector<8x128xf32>
    %cst_55 = arith.constant 1.000000e+00 : f32
    %230 = vector.broadcast %cst_55 : f32 to vector<8x128xf32>
    %231 = arith.subf %230, %223 : vector<8x128xf32>
    %232 = arith.mulf %231, %229 : vector<8x128xf32>
    %233 = arith.mulf %223, %203 : vector<8x128xf32>
    %234 = arith.addf %232, %233 : vector<8x128xf32>
    %c7_i32 = arith.constant 7 : i32
    %cst_56 = arith.constant dense<0.000000e+00> : vector<8x384xf32>
    %235 = tpu.matmul %234, %0, %cst_56 {dimension_numbers = #tpu.dot_dimension_numbers<[1], [0], [0], [1], [0, 0, 1, 1], [], []>} : vector<8x128xf32>, vector<128x384xf32>, vector<8x384xf32> -> vector<8x384xf32>
    %236 = arith.index_cast %c7_i32 : i32 to index
    %c0_57 = arith.constant 0 : index
    %c0_58 = arith.constant 0 : index
    %237 = vector.load %arg0[%236, %c0_57, %c0_58] : memref<8x8x384xf32, #tpu.memory_space<vmem>>, vector<1x8x384xf32>
    %238 = vector.shape_cast %237 : vector<1x8x384xf32> to vector<8x384xf32>
    %239 = vector.extract_strided_slice %238 {offsets = [0, 0], sizes = [8, 128], strides = [1, 1]} : vector<8x384xf32> to vector<8x128xf32>
    %240 = vector.extract_strided_slice %235 {offsets = [0, 0], sizes = [8, 128], strides = [1, 1]} : vector<8x384xf32> to vector<8x128xf32>
    %241 = arith.addf %239, %240 : vector<8x128xf32>
    %242 = arith.negf %241 : vector<8x128xf32>
    %243 = math.exp %242 : vector<8x128xf32>
    %cst_59 = arith.constant 1.000000e+00 : f32
    %244 = vector.broadcast %cst_59 : f32 to vector<8x128xf32>
    %245 = arith.addf %244, %243 : vector<8x128xf32>
    %246 = arith.divf %244, %245 : vector<8x128xf32>
    %247 = vector.extract_strided_slice %238 {offsets = [0, 128], sizes = [8, 128], strides = [1, 1]} : vector<8x384xf32> to vector<8x128xf32>
    %248 = vector.extract_strided_slice %235 {offsets = [0, 128], sizes = [8, 128], strides = [1, 1]} : vector<8x384xf32> to vector<8x128xf32>
    %249 = arith.addf %247, %248 : vector<8x128xf32>
    %250 = arith.negf %249 : vector<8x128xf32>
    %251 = math.exp %250 : vector<8x128xf32>
    %cst_60 = arith.constant 1.000000e+00 : f32
    %252 = vector.broadcast %cst_60 : f32 to vector<8x128xf32>
    %253 = arith.addf %252, %251 : vector<8x128xf32>
    %254 = arith.divf %252, %253 : vector<8x128xf32>
    %255 = vector.extract_strided_slice %238 {offsets = [0, 256], sizes = [8, 128], strides = [1, 1]} : vector<8x384xf32> to vector<8x128xf32>
    %256 = vector.extract_strided_slice %235 {offsets = [0, 256], sizes = [8, 128], strides = [1, 1]} : vector<8x384xf32> to vector<8x128xf32>
    %257 = arith.addf %256, %1 : vector<8x128xf32>
    %258 = arith.mulf %246, %257 : vector<8x128xf32>
    %259 = arith.addf %255, %258 : vector<8x128xf32>
    %260 = math.tanh %259 : vector<8x128xf32>
    %cst_61 = arith.constant 1.000000e+00 : f32
    %261 = vector.broadcast %cst_61 : f32 to vector<8x128xf32>
    %262 = arith.subf %261, %254 : vector<8x128xf32>
    %263 = arith.mulf %262, %260 : vector<8x128xf32>
    %264 = arith.mulf %254, %234 : vector<8x128xf32>
    %265 = arith.addf %263, %264 : vector<8x128xf32>
    %c7_i32_62 = arith.constant 7 : i32
    %c0_63 = arith.constant 0 : index
    %c0_64 = arith.constant 0 : index
    %266 = vector.load %arg7[%c0_63, %c0_64] : memref<8x128xf32, #tpu.memory_space<vmem>>, vector<8x128xf32>
    tpu.vector_store %arg7[%c0_63, %c0_64], %265 {strides = array<i32>} : memref<8x128xf32, #tpu.memory_space<vmem>>, vector<8x128xf32>,
    return
  }
}

</mosaic_0001>

<bundles_post_ra>
// kernel: decoder_rnn_forward.1
= control target key start
LH: loop header
LB: loop body
LE: loop exit
PB: predicated region body
PF: predicated region fallthrough
CT: control target
= control target key end

     0   :  { %s2298_s2 = inlined_call_operand.vmem [shape: f32[128,384], index: 2, kind: input, shape index: {}]   ;;  %s2299_s1 = inlined_call_operand.vmem [shape: f32[8,128], index: 1, kind: input, shape index: {}]   ;;  %s2300_s4 = inlined_call_operand.vmem [shape: f32[128,128], index: 4, kind: input, shape index: {}]   ;;  %s2301_s0 = inlined_call_operand.vmem [shape: f32[8,8,384], index: 0, kind: input, shape index: {}]   ;;  %s2302_s3 = inlined_call_operand.vmem [shape: f32[8,128], index: 3, kind: input, shape index: {}]   ;;  %s2303_s5 = inlined_call_operand.vmem [shape: f32[8,128], index: 5, kind: input, shape index: {}]   ;;  %s2304_s6 = inlined_call_operand.vmem [shape: f32[8,128], index: 6, kind: output, shape index: {0}]   ;;  %s2305_s7 = inlined_call_operand.vmem [shape: f32[8,128], index: 7, kind: output, shape index: {1}]  }
   0x1   :  { %v1241_v0 = vld [vmem:[%s2298_s2 + $0x168] sm:$0xff]  ;;  %v1246_v1 = vld [vmem:[%s2298_s2 + $0x170] sm:$0xff]  ;;  %v1258_v3 = vld [vmem:[%s2298_s2 + $0x158] sm:$0xff] }
   0x2   :  { %v1251_v2 = vld [vmem:[%s2298_s2 + $0x150] sm:$0xff]  ;;  %75 = vmatpush.msra.mxu0 %v1241_v0  ;;  %95 = vmatpush.msra.mxu1 %v1246_v1  ;;  %v1263_v4 = vld [vmem:[%s2298_s2 + $0x138] sm:$0xff]  ;;  %v1268_v5 = vld [vmem:[%s2298_s2 + $0x140] sm:$0xff] }
   0x3   :  { %v1275_v6 = vld [vmem:[%s2298_s2 + $0x120] sm:$0xff]  ;;  %v1280_v7 = vld [vmem:[%s2298_s2 + $0x128] sm:$0xff]  ;;  %v1292_v9 = vld [vmem:[%s2298_s2 + $0x110] sm:$0xff] }
   0x4   :  { %76 = vmatpush.msra.mxu0 %v1251_v2  ;;  %96 = vmatpush.msra.mxu1 %v1258_v3  ;;  %v1287_v8 = vld [vmem:[%s2298_s2 + $0x108] sm:$0xff]  ;;  %v1299_v10 = vld [vmem:[%s2298_s2 + $0xf0] sm:$0xff]  ;;  %v1304_v11 = vld [vmem:[%s2298_s2 + $0xf8] sm:$0xff] }
   0x5   :  { %v1309_v12 = vld [vmem:[%s2298_s2 + $0x178] sm:$0xff]  ;;  %v1316_v13 = vld [vmem:[%s2298_s2 + $0x160] sm:$0xff]  ;;  %v1334_v16 = vld [vmem:[%s2298_s2 + $0x148] sm:$0xff] }
   0x6   :  { %77 = vmatpush.msra.mxu0 %v1263_v4  ;;  %97 = vmatpush.msra.mxu1 %v1268_v5  ;;  %v1321_v14 = vld [vmem:[%s2298_s2 + $0xd8] sm:$0xff]  ;;  %v1326_v15 = vld [vmem:[%s2298_s2 + $0xe0] sm:$0xff]  ;;  %v1344_v18 = vld [vmem:[%s2298_s2 + $0xc8] sm:$0xff] }
   0x7   :  { %115 = vmatpush.msra.mxu2 %v1309_v12  ;;  %v1339_v17 = vld [vmem:[%s2298_s2 + $0xc0] sm:$0xff]  ;;  %v1352_v19 = vld [vmem:[%s2298_s2 + $0x130] sm:$0xff]  ;;  %v1357_v20 = vld [vmem:[%s2298_s2 + $0xa8] sm:$0xff] }
   0x8   :  { %78 = vmatpush.msra.mxu0 %v1275_v6  ;;  %98 = vmatpush.msra.mxu1 %v1280_v7  ;;  %v1362_v21 = vld [vmem:[%s2298_s2 + $0xb0] sm:$0xff]  ;;  %v1370_v22 = vld [vmem:[%s2298_s2 + $0x118] sm:$0xff]  ;;  %v1388_v25 = vld [vmem:[%s2298_s2 + $0x100] sm:$0xff] }
   0x9   :  { %116 = vmatpush.msra.mxu2 %v1316_v13  ;;  %v1375_v23 = vld [vmem:[%s2298_s2 + $0x90] sm:$0xff]  ;;  %v1380_v24 = vld [vmem:[%s2298_s2 + $0x98] sm:$0xff]  ;;  %v1398_v27 = vld [vmem:[%s2298_s2 + $0x80] sm:$0xff] }
   0xa   :  { %79 = vmatpush.msra.mxu0 %v1287_v8  ;;  %99 = vmatpush.msra.mxu1 %v1292_v9  ;;  %v1393_v26 = vld [vmem:[%s2298_s2 + $0x78] sm:$0xff]  ;;  %v1406_v28 = vld [vmem:[%s2298_s2 + $0xe8] sm:$0xff]  ;;  %v1411_v29 = vld [vmem:[%s2298_s2 + $0x60] sm:$0xff] }
   0xb   :  { %117 = vmatpush.msra.mxu2 %v1334_v16  ;;  %v1416_v30 = vld [vmem:[%s2298_s2 + $0x68] sm:$0xff]  ;;  %v1424_v31 = vld [vmem:[%s2298_s2 + $0xd0] sm:$0xff]  ;;  %v1442_v34 = vld [vmem:[%s2298_s2 + $0xb8] sm:$0xff] }
   0xc   :  { %80 = vmatpush.msra.mxu0 %v1299_v10  ;;  %100 = vmatpush.msra.mxu1 %v1304_v11  ;;  %v1429_v32 = vld [vmem:[%s2298_s2 + $0x48] sm:$0xff]  ;;  %v1434_v33 = vld [vmem:[%s2298_s2 + $0x50] sm:$0xff]  ;;  %v1452_v36 = vld [vmem:[%s2298_s2 + $0x38] sm:$0xff] }
   0xd   :  { %118 = vmatpush.msra.mxu2 %v1352_v19  ;;  %v1447_v35 = vld [vmem:[%s2298_s2 + $0x30] sm:$0xff]  ;;  %v1460_v37 = vld [vmem:[%s2298_s2 + $0xa0] sm:$0xff]  ;;  %v1465_v38 = vld [vmem:[%s2298_s2 + $0x18] sm:$0xff] }
   0xe   :  { %81 = vmatpush.msra.mxu0 %v1321_v14  ;;  %101 = vmatpush.msra.mxu1 %v1326_v15  ;;  %2320 = vst [vmem:[#allocation2_spill] sm:$0xff] %v1465_v38  ;;  %v1470_v39 = vld [vmem:[%s2298_s2 + $0x20] sm:$0xff]  ;;  %v1478_v40 = vld [vmem:[%s2298_s2 + $0x88] sm:$0xff]  ;;  %v1502_v44 = vld [vmem:[%s2298_s2 + $0x70] sm:$0xff] }
   0xf   :  { %119 = vmatpush.msra.mxu2 %v1370_v22  ;;  %2321 = vst [vmem:[#allocation3_spill] sm:$0xff] %v1470_v39  ;;  %v1483_v41 = vld [vmem:[%s2298_s2] sm:$0xff]  ;;  %v1488_v42 = vld [vmem:[%s2298_s2 + $0x8] sm:$0xff]  ;;  %v1511_v45 = vld [vmem:[%s2298_s2 + $0x58] sm:$0xff] }
  0x10   :  { %82 = vmatpush.msra.mxu0 %v1339_v17  ;;  %102 = vmatpush.msra.mxu1 %v1344_v18  ;;  %2322 = vst [vmem:[#allocation4_spill] sm:$0xff] %v1483_v41  ;;  %v1496_v43 = vld [vmem:[%s2299_s1] sm:$0xff]  ;;  %v1526_v47 = vld [vmem:[%s2298_s2 + $0x28] sm:$0xff]  ;;  %v1534_v48 = vld [vmem:[%s2298_s2 + $0x10] sm:$0xff] }
  0x11   :  { %120 = vmatpush.msra.mxu2 %v1388_v25  ;;  %2323 = vst [vmem:[#allocation5_spill] sm:$0xff] %v1488_v42  ;;  %v1518_v46 = vld [vmem:[%s2298_s2 + $0x40] sm:$0xff]  ;;  %v201_v49 = vld [vmem:[%s2300_s4 + $0x78] sm:$0xff]  ;;  %v200_v50 = vld [vmem:[%s2300_s4 + $0x70] sm:$0xff] }
  0x12   :  { %83 = vmatpush.msra.mxu0 %v1357_v20  ;;  %103 = vmatpush.msra.mxu1 %v1362_v21  ;;  %2324 = vst [vmem:[#allocation6_spill] sm:$0xff] %v1526_v47  ;;  %v199_v51 = vld [vmem:[%s2300_s4 + $0x68] sm:$0xff]  ;;  %v198_v52 = vld [vmem:[%s2300_s4 + $0x60] sm:$0xff]  ;;  %v197_v53 = vld [vmem:[%s2300_s4 + $0x58] sm:$0xff] }
  0x13   :  { %121 = vmatpush.msra.mxu2 %v1406_v28  ;;  %2325 = vst [vmem:[#allocation7_spill] sm:$0xff] %v1534_v48  ;;  %203 = vmatpush.msra.mxu3 %v201_v49  ;;  %v196_v54 = vld [vmem:[%s2300_s4 + $0x50] sm:$0xff]  ;;  %v195_v55 = vld [vmem:[%s2300_s4 + $0x48] sm:$0xff]  ;;  %v194_v56 = vld [vmem:[%s2300_s4 + $0x40] sm:$0xff] }
  0x14   :  { %84 = vmatpush.msra.mxu0 %v1375_v23  ;;  %104 = vmatpush.msra.mxu1 %v1380_v24  ;;  %v135_v57 = vld [vmem:[%s2301_s0] sm:$0xff]  ;;  %v136_v58 = vld [vmem:[%s2301_s0 + $0x8] sm:$0xff]  ;;  %v193_v59 = vld [vmem:[%s2300_s4 + $0x38] sm:$0xff] }
  0x15   :  { %122 = vmatpush.msra.mxu2 %v1424_v31  ;;  %204 = vmatpush.msra.mxu3 %v200_v50  ;;  %v192_v49 = vld [vmem:[%s2300_s4 + $0x30] sm:$0xff] }
  0x16   :  { %85 = vmatpush.msra.mxu0 %v1393_v26  ;;  %105 = vmatpush.msra.mxu1 %v1398_v27 }
  0x17   :  { %123 = vmatpush.msra.mxu2 %v1442_v34  ;;  %205 = vmatpush.msra.mxu3 %v199_v51 }
  0x18   :  { %86 = vmatpush.msra.mxu0 %v1411_v29  ;;  %106 = vmatpush.msra.mxu1 %v1416_v30 }
  0x19   :  { %124 = vmatpush.msra.mxu2 %v1460_v37  ;;  %206 = vmatpush.msra.mxu3 %v198_v52  ;;  %v191_v52 = vld [vmem:[%s2300_s4 + $0x28] sm:$0xff] }
  0x1a   :  { %87 = vmatpush.msra.mxu0 %v1429_v32  ;;  %107 = vmatpush.msra.mxu1 %v1434_v33 }
  0x1b   :  { %125 = vmatpush.msra.mxu2 %v1478_v40  ;;  %207 = vmatpush.msra.mxu3 %v197_v53  ;;  %v190_v53 = vld [vmem:[%s2300_s4 + $0x20] sm:$0xff] }
  0x1c   :  { %88 = vmatpush.msra.mxu0 %v1447_v35  ;;  %108 = vmatpush.msra.mxu1 %v1452_v36 }
  0x1d   :  { %126 = vmatpush.msra.mxu2 %v1502_v44  ;;  %208 = vmatpush.msra.mxu3 %v196_v54  ;;  %v189_v54 = vld [vmem:[%s2300_s4 + $0x18] sm:$0xff] }
  0x1e   :  { %89 = vmatpush.msra.mxu0 %v1465_v38  ;;  %109 = vmatpush.msra.mxu1 %v1470_v39 }
  0x1f   :  { %127 = vmatpush.msra.mxu2 %v1511_v45  ;;  %209 = vmatpush.msra.mxu3 %v195_v55  ;;  %v188_v55 = vld [vmem:[%s2300_s4 + $0x10] sm:$0xff] }
  0x20   :  { %90 = vmatpush.msra.mxu0 %v1483_v41  ;;  %110 = vmatpush.msra.mxu1 %v1488_v42 }
  0x21   :  { %91 = vmatmul.f32.vlgmr.msra.gmra.mxu0 %v1496_v43  ;;  %111 = vmatmul.f32.vlgmr.msra.gmra.mxu1 %v1496_v43 }
  0x22   :  { %235 = vmatpush.msrb.mxu0 %v1241_v0  ;;  %255 = vmatpush.msrb.mxu1 %v1246_v1 }
  0x23   :  { %128 = vmatpush.msra.mxu2 %v1518_v46  ;;  %210 = vmatpush.msra.mxu3 %v194_v56  ;;  %v187_v56 = vld [vmem:[%s2300_s4 + $0x8] sm:$0xff] }
  0x24   :  { %236 = vmatpush.msrb.mxu0 %v1251_v2  ;;  %256 = vmatpush.msrb.mxu1 %v1258_v3 }
  0x25   :  { %129 = vmatpush.msra.mxu2 %v1526_v47  ;;  %211 = vmatpush.msra.mxu3 %v193_v59 }
  0x26   :  { %237 = vmatpush.msrb.mxu0 %v1263_v4  ;;  %257 = vmatpush.msrb.mxu1 %v1268_v5 }
  0x27   :  { %130 = vmatpush.msra.mxu2 %v1534_v48  ;;  %212 = vmatpush.msra.mxu3 %v192_v49 }
  0x28   :  { %238 = vmatpush.msrb.mxu0 %v1275_v6  ;;  %258 = vmatpush.msrb.mxu1 %v1280_v7 }
  0x29   :  { %131 = vmatmul.f32.vlgmr.msra.gmra.mxu2 %v1496_v43  ;;  %213 = vmatpush.msra.mxu3 %v191_v52 }
  0x2a   :  { %239 = vmatpush.msrb.mxu0 %v1287_v8  ;;  %259 = vmatpush.msrb.mxu1 %v1292_v9 }
  0x2b   :  { %275 = vmatpush.msrb.mxu2 %v1309_v12  ;;  %214 = vmatpush.msra.mxu3 %v190_v53  ;;  %v1692_v53 = vld [vmem:[%s2302_s3] sm:$0xff] }
  0x2c   :  { %240 = vmatpush.msrb.mxu0 %v1299_v10  ;;  %260 = vmatpush.msrb.mxu1 %v1304_v11  ;;  %2326 = vst [vmem:[#allocation8_spill] sm:$0xff] %v1692_v53 }
  0x2d   :  { %276 = vmatpush.msrb.mxu2 %v1316_v13  ;;  %215 = vmatpush.msra.mxu3 %v189_v54 }
  0x2e   :  { %241 = vmatpush.msrb.mxu0 %v1321_v14  ;;  %261 = vmatpush.msrb.mxu1 %v1326_v15 }
  0x2f   :  { %277 = vmatpush.msrb.mxu2 %v1334_v16  ;;  %216 = vmatpush.msra.mxu3 %v188_v55 }
  0x30   :  { %242 = vmatpush.msrb.mxu0 %v1339_v17  ;;  %262 = vmatpush.msrb.mxu1 %v1344_v18 }
  0x31   :  { %278 = vmatpush.msrb.mxu2 %v1352_v19  ;;  %217 = vmatpush.msra.mxu3 %v187_v56 }
  0x32   :  { %243 = vmatpush.msrb.mxu0 %v1357_v20  ;;  %263 = vmatpush.msrb.mxu1 %v1362_v21 }
  0x33   :  { %279 = vmatpush.msrb.mxu2 %v1370_v22 }
  0x34   :  { %244 = vmatpush.msrb.mxu0 %v1375_v23  ;;  %264 = vmatpush.msrb.mxu1 %v1380_v24 }
  0x35   :  { %280 = vmatpush.msrb.mxu2 %v1388_v25 }
  0x36   :  { %245 = vmatpush.msrb.mxu0 %v1393_v26  ;;  %265 = vmatpush.msrb.mxu1 %v1398_v27 }
  0x37   :  { %281 = vmatpush.msrb.mxu2 %v1406_v28 }
  0x38   :  { %246 = vmatpush.msrb.mxu0 %v1411_v29  ;;  %266 = vmatpush.msrb.mxu1 %v1416_v30 }
  0x39   :  { %282 = vmatpush.msrb.mxu2 %v1424_v31 }
  0x3a   :  { %247 = vmatpush.msrb.mxu0 %v1429_v32  ;;  %267 = vmatpush.msrb.mxu1 %v1434_v33 }
  0x3b   :  { %283 = vmatpush.msrb.mxu2 %v1442_v34 }
  0x3c   :  { %248 = vmatpush.msrb.mxu0 %v1447_v35  ;;  %268 = vmatpush.msrb.mxu1 %v1452_v36 }
  0x3d   :  { %284 = vmatpush.msrb.mxu2 %v1460_v37 }
  0x3e   :  { %249 = vmatpush.msrb.mxu0 %v1465_v38  ;;  %269 = vmatpush.msrb.mxu1 %v1470_v39 }
  0x3f   :  { %285 = vmatpush.msrb.mxu2 %v1478_v40 }
  0x40   :  { %250 = vmatpush.msrb.mxu0 %v1483_v41  ;;  %270 = vmatpush.msrb.mxu1 %v1488_v42 }
  0x41   :  { %286 = vmatpush.msrb.mxu2 %v1502_v44 }
  0x42   :  { %367 = vmatpush.msra.mxu0 %v1246_v1  ;;  %387 = vmatpush.msra.mxu1 %v1309_v12 }
  0x43   :  { %287 = vmatpush.msrb.mxu2 %v1511_v45 }
  0x44   :  { %368 = vmatpush.msra.mxu0 %v1258_v3  ;;  %388 = vmatpush.msra.mxu1 %v1316_v13 }
  0x45   :  { %288 = vmatpush.msrb.mxu2 %v1518_v46 }
  0x46   :  { %369 = vmatpush.msra.mxu0 %v1268_v5  ;;  %389 = vmatpush.msra.mxu1 %v1334_v16 }
  0x47   :  { %289 = vmatpush.msrb.mxu2 %v1526_v47 }
  0x48   :  { %370 = vmatpush.msra.mxu0 %v1280_v7  ;;  %390 = vmatpush.msra.mxu1 %v1352_v19 }
  0x49   :  { %290 = vmatpush.msrb.mxu2 %v1534_v48 }
  0x4a   :  { %371 = vmatpush.msra.mxu0 %v1292_v9  ;;  %391 = vmatpush.msra.mxu1 %v1370_v22 }
  0x4b   :  { %459 = vmatpush.msra.mxu2 %v1241_v0 }
  0x4c   :  { %372 = vmatpush.msra.mxu0 %v1304_v11  ;;  %392 = vmatpush.msra.mxu1 %v1388_v25 }
  0x4d   :  { %460 = vmatpush.msra.mxu2 %v1251_v2 }
  0x4e   :  { %373 = vmatpush.msra.mxu0 %v1326_v15  ;;  %393 = vmatpush.msra.mxu1 %v1406_v28 }
  0x4f   :  { %461 = vmatpush.msra.mxu2 %v1263_v4 }
  0x50   :  { %374 = vmatpush.msra.mxu0 %v1344_v18  ;;  %394 = vmatpush.msra.mxu1 %v1424_v31 }
  0x51   :  { %462 = vmatpush.msra.mxu2 %v1275_v6 }
  0x52   :  { %375 = vmatpush.msra.mxu0 %v1362_v21  ;;  %395 = vmatpush.msra.mxu1 %v1442_v34 }
  0x53   :  { %463 = vmatpush.msra.mxu2 %v1287_v8 }
  0x54   :  { %376 = vmatpush.msra.mxu0 %v1380_v24  ;;  %396 = vmatpush.msra.mxu1 %v1460_v37 }
  0x55   :  { %464 = vmatpush.msra.mxu2 %v1299_v10 }
  0x56   :  { %377 = vmatpush.msra.mxu0 %v1398_v27  ;;  %397 = vmatpush.msra.mxu1 %v1478_v40 }
  0x57   :  { %465 = vmatpush.msra.mxu2 %v1321_v14 }
  0x58   :  { %378 = vmatpush.msra.mxu0 %v1416_v30  ;;  %398 = vmatpush.msra.mxu1 %v1502_v44 }
  0x59   :  { %466 = vmatpush.msra.mxu2 %v1339_v17 }
  0x5a   :  { %379 = vmatpush.msra.mxu0 %v1434_v33  ;;  %399 = vmatpush.msra.mxu1 %v1511_v45 }
  0x5b   :  { %467 = vmatpush.msra.mxu2 %v1357_v20 }
  0x5c   :  { %380 = vmatpush.msra.mxu0 %v1452_v36  ;;  %400 = vmatpush.msra.mxu1 %v1518_v46 }
  0x5d   :  { %468 = vmatpush.msra.mxu2 %v1375_v23 }
  0x5e   :  { %381 = vmatpush.msra.mxu0 %v1470_v39  ;;  %401 = vmatpush.msra.mxu1 %v1526_v47 }
  0x5f   :  { %469 = vmatpush.msra.mxu2 %v1393_v26 }
  0x60   :  { %382 = vmatpush.msra.mxu0 %v1488_v42  ;;  %402 = vmatpush.msra.mxu1 %v1534_v48 }
  0x61   :  { %470 = vmatpush.msra.mxu2 %v1411_v29 }
  0x63   :  { %471 = vmatpush.msra.mxu2 %v1429_v32 }
  0x65   :  { %472 = vmatpush.msra.mxu2 %v1447_v35 }
  0x67   :  { %473 = vmatpush.msra.mxu2 %v1465_v38 }
  0x69   :  { %474 = vmatpush.msra.mxu2 %v1483_v41 }
  0x9e   :  { %v92_v60 = vpop.f32.mrf.mxu0  ;;  %v112_v61 = vpop.f32.mrf.mxu1 }
  0x9f   :  { %v138_v62 = vadd.f32 %v135_v57, %v92_v60  ;;  %v158_v63 = vadd.f32 %v136_v58, %v112_v61  ;;  %v186_v58 = vld [vmem:[%s2300_s4] sm:$0xff] }
  0xa0   :  { %218 = vmatpush.msra.mxu3 %v186_v58 }
  0xa1   :  { %v1028_v50 = vmul.f32 -1.442695, %v138_v62  ;;  %v1029_v51 = vmul.f32 -1.442695, %v158_v63 }
  0xa2   :  { %347 = vmatpush.msrb.mxu3 %v1241_v0 }
  0xa3   :  { %1065 = vpow2.f32 %v1028_v50 }
  0xa4   :  { %1067 = vpow2.f32 %v1029_v51  ;;  %348 = vmatpush.msrb.mxu3 %v1251_v2 }
  0xa6   :  { %349 = vmatpush.msrb.mxu3 %v1263_v4 }
  0xa8   :  { %350 = vmatpush.msrb.mxu3 %v1275_v6 }
  0xa9   :  { %v1066_v57 = vpop.eup %1065 }
  0xaa   :  { %v1068_v59 = vpop.eup %1067  ;;  %v142_v60 = vadd.f32 1.0, %v1066_v57  ;;  %351 = vmatpush.msrb.mxu3 %v1287_v8 }
  0xab   :  { %v162_v61 = vadd.f32 1.0, %v1068_v59 }
  0xac   :  { %1069 = vrcp.f32 %v142_v60  ;;  %v132_v54 = vpop.f32.mrf.mxu2  ;;  %v154_v55 = vand.u32 2147483648, %v142_v60  ;;  %v152_v57 = vand.u32 2147483647, %v142_v60  ;;  %352 = vmatpush.msrb.mxu3 %v1299_v10  ;;  %vm148_vm1 = vweird.f32 %v142_v60 }
  0xad   :  { %1071 = vrcp.f32 %v162_v61  ;;  %vm168_vm4 = vweird.f32 %v162_v61 }
  0xae   :  { %353 = vmatpush.msrb.mxu3 %v1321_v14  ;;  %vm153_vm3 = vcmp.eq.f32.partialorder %v152_v57, 8.507059e+37 }
  0xb0   :  { %354 = vmatpush.msrb.mxu3 %v1339_v17 }
  0xb2   :  { %v1070_v62 = vpop.eup %1069  ;;  %355 = vmatpush.msrb.mxu3 %v1357_v20 }
  0xb3   :  { %v1072_v63 = vpop.eup %1071  ;;  %v144_v49 = vmul.f32 %v1070_v62, %v142_v60  ;;  %vm149_vm0 = vweird.f32 %v1070_v62 }
  0xb4   :  { %v164_v50 = vmul.f32 %v1072_v63, %v162_v61  ;;  %vm150_vm2 = vmor %vm148_vm1, %vm149_vm0  ;;  %vm169_vm5 = vweird.f32 %v1072_v63  ;;  %356 = vmatpush.msrb.mxu3 %v1375_v23 }
  0xb5   :  { %v145_v51 = vsub.f32 1.0, %v144_v49  ;;  %v178_v49 = vadd.f32 %v132_v54, %v1692_v53  ;;  %v172_v54 = vand.u32 2147483647, %v162_v61  ;;  %vm170_vm6 = vmor %vm168_vm4, %vm169_vm5 }
  0xb6   :  { %v165_v52 = vsub.f32 1.0, %v164_v50  ;;  %v155_v50 = vor.u32 1.1754944e-38, %v154_v55  ;;  %357 = vmatpush.msrb.mxu3 %v1393_v26 }
  0xb7   :  { %v146_v56 = vmul.f32 %v1070_v62, %v145_v51  ;;  %v137_v51 = vld [vmem:[%s2301_s0 + $0x10] sm:$0xff]  ;;  %vm173_vm7 = vcmp.eq.f32.partialorder %v172_v54, 8.507059e+37 }
  0xb8   :  { %v166_v58 = vmul.f32 %v1072_v63, %v165_v52  ;;  %358 = vmatpush.msrb.mxu3 %v1411_v29 }
  0xb9   :  { %v147_v59 = vadd.f32 %v1070_v62, %v146_v56  ;;  %v174_v56 = vand.u32 2147483648, %v162_v61 }
  0xba   :  { %v167_v42 = vadd.f32 %v1072_v63, %v166_v58  ;;  %359 = vmatpush.msrb.mxu3 %v1429_v32 }
  0xbb   :  { %v151_v48 = vsel %vm150_vm2, %v1070_v62, %v147_v59  ;;  %v175_v55 = vor.u32 1.1754944e-38, %v174_v56 }
  0xbc   :  { %v156_v52 = vsel %vm153_vm3, %v155_v50, %v151_v48  ;;  %v171_v62 = vsel %vm170_vm6, %v1072_v63, %v167_v42  ;;  %360 = vmatpush.msrb.mxu3 %v1447_v35  ;;  %v2328_v63 = vld [vmem:[#allocation7_spill] sm:$0xff] }
  0xbd   :  { %v179_v60 = vmul.f32 %v178_v49, %v156_v52  ;;  %v176_v57 = vsel %vm173_vm7, %v175_v55, %v171_v62  ;;  %v1031_v49 = vld [vmem:[%s2301_s0 + $0x20] sm:$0xff] }
  0xbe   :  { %v182_v48 = vsub.f32 1.0, %v176_v57  ;;  %v184_v59 = vmul.f32 %v176_v57, %v1496_v43  ;;  %361 = vmatpush.msrb.mxu3 %v1465_v38  ;;  %v2327_v43 = vld [vmem:[#allocation5_spill] sm:$0xff]  ;;  %v202_v62 = vld [vmem:[%s2303_s5] sm:$0xff] }
  0xbf   :  { %v180_v53 = vadd.f32 %v179_v60, %v137_v51 }
  0xc0   :  { %362 = vmatpush.msrb.mxu3 %v1483_v41 }
  0xc1   :  { %1073 = vtanh.f32 %v180_v53  ;;  %v1030_v53 = vld [vmem:[%s2301_s0 + $0x18] sm:$0xff] }
  0xc7   :  { %v1074_v58 = vpop.eup %1073 }
  0xc8   :  { %v183_v61 = vmul.f32 %v1074_v58, %v182_v48 }
  0xca   :  { %v1709_v42 = vadd.f32 %v184_v59, %v183_v61 }
  0xcc   :  { %219 = vmatmul.f32.vlgmr.msra.gmra.mxu3 %v1709_v42  ;;  %251 = vmatmul.f32.vlgmr.msrb.gmra.mxu0 %v1709_v42 }
  0xcd   :  { %271 = vmatmul.f32.vlgmr.msrb.gmra.mxu1 %v1709_v42  ;;  %291 = vmatmul.f32.vlgmr.msrb.gmra.mxu2 %v1709_v42 }
  0xce   :  { %479 = vmatpush.msra.mxu3 %v1246_v1  ;;  %499 = vmatpush.msrb.mxu0 %v1309_v12 }
  0xcf   :  { %571 = vmatpush.msrb.mxu1 %v1241_v0  ;;  %591 = vmatpush.msrb.mxu2 %v1246_v1 }
  0xd0   :  { %480 = vmatpush.msra.mxu3 %v1258_v3  ;;  %500 = vmatpush.msrb.mxu0 %v1316_v13 }
  0xd1   :  { %572 = vmatpush.msrb.mxu1 %v1251_v2  ;;  %592 = vmatpush.msrb.mxu2 %v1258_v3 }
  0xd2   :  { %481 = vmatpush.msra.mxu3 %v1268_v5  ;;  %501 = vmatpush.msrb.mxu0 %v1334_v16 }
  0xd3   :  { %573 = vmatpush.msrb.mxu1 %v1263_v4  ;;  %593 = vmatpush.msrb.mxu2 %v1268_v5 }
  0xd4   :  { %482 = vmatpush.msra.mxu3 %v1280_v7  ;;  %502 = vmatpush.msrb.mxu0 %v1352_v19 }
  0xd5   :  { %574 = vmatpush.msrb.mxu1 %v1275_v6  ;;  %594 = vmatpush.msrb.mxu2 %v1280_v7 }
  0xd6   :  { %483 = vmatpush.msra.mxu3 %v1292_v9  ;;  %503 = vmatpush.msrb.mxu0 %v1370_v22 }
  0xd7   :  { %575 = vmatpush.msrb.mxu1 %v1287_v8  ;;  %595 = vmatpush.msrb.mxu2 %v1292_v9 }
  0xd8   :  { %484 = vmatpush.msra.mxu3 %v1304_v11  ;;  %504 = vmatpush.msrb.mxu0 %v1388_v25 }
  0xd9   :  { %576 = vmatpush.msrb.mxu1 %v1299_v10  ;;  %596 = vmatpush.msrb.mxu2 %v1304_v11 }
  0xda   :  { %485 = vmatpush.msra.mxu3 %v1326_v15  ;;  %505 = vmatpush.msrb.mxu0 %v1406_v28 }
  0xdb   :  { %577 = vmatpush.msrb.mxu1 %v1321_v14  ;;  %597 = vmatpush.msrb.mxu2 %v1326_v15 }
  0xdc   :  { %486 = vmatpush.msra.mxu3 %v1344_v18  ;;  %506 = vmatpush.msrb.mxu0 %v1424_v31 }
  0xdd   :  { %578 = vmatpush.msrb.mxu1 %v1339_v17  ;;  %598 = vmatpush.msrb.mxu2 %v1344_v18 }
  0xde   :  { %487 = vmatpush.msra.mxu3 %v1362_v21  ;;  %507 = vmatpush.msrb.mxu0 %v1442_v34 }
  0xdf   :  { %579 = vmatpush.msrb.mxu1 %v1357_v20  ;;  %599 = vmatpush.msrb.mxu2 %v1362_v21 }
  0xe0   :  { %488 = vmatpush.msra.mxu3 %v1380_v24  ;;  %508 = vmatpush.msrb.mxu0 %v1460_v37 }
  0xe1   :  { %580 = vmatpush.msrb.mxu1 %v1375_v23  ;;  %600 = vmatpush.msrb.mxu2 %v1380_v24 }
  0xe2   :  { %489 = vmatpush.msra.mxu3 %v1398_v27  ;;  %509 = vmatpush.msrb.mxu0 %v1478_v40 }
  0xe3   :  { %581 = vmatpush.msrb.mxu1 %v1393_v26  ;;  %601 = vmatpush.msrb.mxu2 %v1398_v27 }
  0xe4   :  { %490 = vmatpush.msra.mxu3 %v1416_v30  ;;  %510 = vmatpush.msrb.mxu0 %v1502_v44 }
  0xe5   :  { %582 = vmatpush.msrb.mxu1 %v1411_v29  ;;  %602 = vmatpush.msrb.mxu2 %v1416_v30 }
  0xe6   :  { %491 = vmatpush.msra.mxu3 %v1434_v33  ;;  %511 = vmatpush.msrb.mxu0 %v1511_v45 }
  0xe7   :  { %583 = vmatpush.msrb.mxu1 %v1429_v32  ;;  %603 = vmatpush.msrb.mxu2 %v1434_v33 }
  0xe8   :  { %492 = vmatpush.msra.mxu3 %v1452_v36  ;;  %512 = vmatpush.msrb.mxu0 %v1518_v46 }
  0xe9   :  { %584 = vmatpush.msrb.mxu1 %v1447_v35  ;;  %604 = vmatpush.msrb.mxu2 %v1452_v36 }
  0xea   :  { %493 = vmatpush.msra.mxu3 %v1470_v39  ;;  %513 = vmatpush.msrb.mxu0 %v1526_v47 }
  0xeb   :  { %585 = vmatpush.msrb.mxu1 %v1465_v38  ;;  %605 = vmatpush.msrb.mxu2 %v1470_v39  ;;  %v1032_v39 = vld [vmem:[%s2301_s0 + $0x28] sm:$0xff] }
  0xec   :  { %494 = vmatpush.msra.mxu3 %v2327_v43  ;;  %514 = vmatpush.msrb.mxu0 %v2328_v63 }
  0xed   :  { %586 = vmatpush.msrb.mxu1 %v1483_v41  ;;  %606 = vmatpush.msrb.mxu2 %v2327_v43 }
 0x149   :  { %v252_v50 = vpop.f32.mrf.mxu0 }
 0x14a   :  { %v299_v51 = vadd.f32 %v1030_v53, %v252_v50  ;;  %v272_v52 = vpop.f32.mrf.mxu1 }
 0x14b   :  { %v319_v56 = vadd.f32 %v1031_v49, %v272_v52 }
 0x14c   :  { %v1033_v60 = vmul.f32 -1.442695, %v299_v51 }
 0x14d   :  { %v1034_v54 = vmul.f32 -1.442695, %v319_v56 }
 0x14e   :  { %1075 = vpow2.f32 %v1033_v60 }
 0x14f   :  { %1077 = vpow2.f32 %v1034_v54  ;;  %v220_v55 = vpop.f32.mrf.mxu3 }
 0x150   :  { %v1789_v57 = vadd.f32 %v220_v55, %v202_v62  ;;  %v292_v55 = vpop.f32.mrf.mxu2 }
 0x152   :  { %2329 = vst [vmem:[#allocation9_spill] sm:$0xff] %v1789_v57  ;;  %223 = vmax.xlane.f32.xlu0 %v1789_v57 }
 0x154   :  { %v1076_v48 = vpop.eup %1075 }
 0x155   :  { %v1078_v58 = vpop.eup %1077  ;;  %v303_v61 = vadd.f32 1.0, %v1076_v48 }
 0x156   :  { %v323_v59 = vadd.f32 1.0, %v1078_v58  ;;  %v2330_v58 = vld [vmem:[#allocation8_spill] sm:$0xff] }
 0x157   :  { %1079 = vrcp.f32 %v303_v61  ;;  %v315_v43 = vand.u32 2147483648, %v303_v61  ;;  %v313_v54 = vand.u32 2147483647, %v303_v61  ;;  %vm309_vm9 = vweird.f32 %v303_v61 }
 0x158   :  { %1081 = vrcp.f32 %v323_v59  ;;  %v339_v63 = vadd.f32 %v292_v55, %v2330_v58  ;;  %v335_v38 = vand.u32 2147483648, %v323_v59  ;;  %vm329_vm13 = vweird.f32 %v323_v59 }
 0x159   :  { %v316_v57 = vor.u32 1.1754944e-38, %v315_v43  ;;  %vm314_vm11 = vcmp.eq.f32.partialorder %v313_v54, 8.507059e+37 }
 0x15a   :  { %v336_v43 = vor.u32 1.1754944e-38, %v335_v38 }
 0x15d   :  { %v1080_v53 = vpop.eup %1079 }
 0x15e   :  { %v1082_v49 = vpop.eup %1081  ;;  %v305_v50 = vmul.f32 %v1080_v53, %v303_v61  ;;  %vm310_vm8 = vweird.f32 %v1080_v53 }
 0x15f   :  { %v325_v51 = vmul.f32 %v1082_v49, %v323_v59  ;;  %vm311_vm10 = vmor %vm309_vm9, %vm310_vm8  ;;  %vm330_vm12 = vweird.f32 %v1082_v49 }
 0x160   :  { %v306_v52 = vsub.f32 1.0, %v305_v50  ;;  %vm331_vm14 = vmor %vm329_vm13, %vm330_vm12 }
 0x161   :  { %v326_v56 = vsub.f32 1.0, %v325_v51 }
 0x162   :  { %v307_v60 = vmul.f32 %v1080_v53, %v306_v52 }
 0x163   :  { %v327_v62 = vmul.f32 %v1082_v49, %v326_v56  ;;  %v333_v56 = vand.u32 2147483647, %v323_v59 }
 0x164   :  { %v308_v41 = vadd.f32 %v1080_v53, %v307_v60 }
 0x165   :  { %v328_v51 = vadd.f32 %v1082_v49, %v327_v62  ;;  %vm334_vm15 = vcmp.eq.f32.partialorder %v333_v56, 8.507059e+37 }
 0x166   :  { %v312_v48 = vsel %vm311_vm10, %v1080_v53, %v308_v41 }
 0x167   :  { %v317_v50 = vsel %vm314_vm11, %v316_v57, %v312_v48  ;;  %v332_v61 = vsel %vm331_vm14, %v1082_v49, %v328_v51  ;;  %v1037_v57 = vld [vmem:[%s2301_s0 + $0x40] sm:$0xff] }
 0x168   :  { %v340_v52 = vmul.f32 %v339_v63, %v317_v50  ;;  %v337_v41 = vsel %vm334_vm15, %v336_v43, %v332_v61 }
 0x169   :  { %v343_v53 = vsub.f32 1.0, %v337_v41  ;;  %v345_v55 = vmul.f32 %v337_v41, %v1709_v42 }
 0x16a   :  { %v341_v47 = vadd.f32 %v1032_v39, %v340_v52  ;;  %v2338_v39 = vld [vmem:[#allocation8_spill] sm:$0xff] }
 0x16c   :  { %1083 = vtanh.f32 %v341_v47 }
 0x172   :  { %v1084_v60 = vpop.eup %1083 }
 0x173   :  { %v344_v54 = vmul.f32 %v1084_v60, %v343_v53 }
 0x175   :  { %v1797_v58 = vadd.f32 %v345_v55, %v344_v54  ;;  %v1873_v54 = vld [vmem:[%s2298_s2 + $0x178] sm:$0xff]  ;;  %v1879_v55 = vld [vmem:[%s2298_s2 + $0x168] sm:$0xff] }
 0x177   :  { %363 = vmatmul.f32.vlgmr.msrb.gmra.mxu3 %v1797_v58  ;;  %383 = vmatmul.f32.vlgmr.msra.gmra.mxu0 %v1797_v58 }
 0x178   :  { %403 = vmatmul.f32.vlgmr.msra.gmra.mxu1 %v1797_v58  ;;  %611 = vmatpush.msrb.mxu3 %v1309_v12 }
 0x179   :  { %683 = vmatpush.msra.mxu0 %v1241_v0  ;;  %703 = vmatpush.msra.mxu1 %v1246_v1  ;;  %v2331_v0 = vld [vmem:[#allocation6_spill] sm:$0xff] }
 0x17a   :  { %612 = vmatpush.msrb.mxu3 %v1316_v13  ;;  %v2332_v1 = vld [vmem:[#allocation2_spill] sm:$0xff] }
 0x17b   :  { %684 = vmatpush.msra.mxu0 %v1251_v2  ;;  %704 = vmatpush.msra.mxu1 %v1258_v3  ;;  %v2333_v2 = vld [vmem:[#allocation3_spill] sm:$0xff] }
 0x17c   :  { %613 = vmatpush.msrb.mxu3 %v1334_v16  ;;  %v2334_v3 = vld [vmem:[#allocation7_spill] sm:$0xff] }
 0x17d   :  { %685 = vmatpush.msra.mxu0 %v1263_v4  ;;  %705 = vmatpush.msra.mxu1 %v1268_v5  ;;  %v2335_v4 = vld [vmem:[#allocation4_spill] sm:$0xff]  ;;  %v2336_v5 = vld [vmem:[#allocation5_spill] sm:$0xff] }
 0x17e   :  { %614 = vmatpush.msrb.mxu3 %v1352_v19 }
 0x17f   :  { %686 = vmatpush.msra.mxu0 %v1275_v6  ;;  %706 = vmatpush.msra.mxu1 %v1280_v7  ;;  %v2337_v7 = vld [vmem:[#allocation9_spill] sm:$0xff] }
 0x180   :  { %615 = vmatpush.msrb.mxu3 %v1370_v22 }
 0x181   :  { %687 = vmatpush.msra.mxu0 %v1287_v8  ;;  %707 = vmatpush.msra.mxu1 %v1292_v9 }
 0x182   :  { %616 = vmatpush.msrb.mxu3 %v1388_v25 }
 0x183   :  { %688 = vmatpush.msra.mxu0 %v1299_v10  ;;  %708 = vmatpush.msra.mxu1 %v1304_v11  ;;  %v1036_v11 = vld [vmem:[%s2301_s0 + $0x38] sm:$0xff] }
 0x184   :  { %617 = vmatpush.msrb.mxu3 %v1406_v28 }
 0x185   :  { %689 = vmatpush.msra.mxu0 %v1321_v14  ;;  %709 = vmatpush.msra.mxu1 %v1326_v15  ;;  %v1035_v15 = vld [vmem:[%s2301_s0 + $0x30] sm:$0xff] }
 0x186   :  { %618 = vmatpush.msrb.mxu3 %v1424_v31 }
 0x187   :  { %690 = vmatpush.msra.mxu0 %v1339_v17  ;;  %710 = vmatpush.msra.mxu1 %v1344_v18 }
 0x188   :  { %619 = vmatpush.msrb.mxu3 %v1442_v34 }
 0x189   :  { %691 = vmatpush.msra.mxu0 %v1357_v20  ;;  %711 = vmatpush.msra.mxu1 %v1362_v21 }
 0x18a   :  { %620 = vmatpush.msrb.mxu3 %v1460_v37 }
 0x18b   :  { %692 = vmatpush.msra.mxu0 %v1375_v23  ;;  %712 = vmatpush.msra.mxu1 %v1380_v24 }
 0x18c   :  { %621 = vmatpush.msrb.mxu3 %v1478_v40 }
 0x18d   :  { %693 = vmatpush.msra.mxu0 %v1393_v26  ;;  %713 = vmatpush.msra.mxu1 %v1398_v27 }
 0x18e   :  { %622 = vmatpush.msrb.mxu3 %v1502_v44 }
 0x18f   :  { %694 = vmatpush.msra.mxu0 %v1411_v29  ;;  %714 = vmatpush.msra.mxu1 %v1416_v30 }
 0x190   :  { %623 = vmatpush.msrb.mxu3 %v1511_v45 }
 0x191   :  { %695 = vmatpush.msra.mxu0 %v1429_v32  ;;  %715 = vmatpush.msra.mxu1 %v1434_v33 }
 0x192   :  { %624 = vmatpush.msrb.mxu3 %v1518_v46 }
 0x193   :  { %696 = vmatpush.msra.mxu0 %v1447_v35  ;;  %716 = vmatpush.msra.mxu1 %v1452_v36 }
 0x194   :  { %625 = vmatpush.msrb.mxu3 %v2331_v0 }
 0x195   :  { %697 = vmatpush.msra.mxu0 %v2332_v1  ;;  %717 = vmatpush.msra.mxu1 %v2333_v2  ;;  %v1891_v1 = vld [vmem:[%s2298_s2 + $0x160] sm:$0xff]  ;;  %v1897_v2 = vld [vmem:[%s2298_s2 + $0x150] sm:$0xff] }
 0x196   :  { %626 = vmatpush.msrb.mxu3 %v2334_v3 }
 0x197   :  { %698 = vmatpush.msra.mxu0 %v2335_v4  ;;  %718 = vmatpush.msra.mxu1 %v2336_v5  ;;  %v1903_v4 = vld [vmem:[%s2298_s2 + $0x158] sm:$0xff]  ;;  %v1909_v5 = vld [vmem:[%s2298_s2 + $0x148] sm:$0xff] }
 0x1c5   :  { %v1850_v6 = vpop.xlane.xlu0 %223 }
 0x1c6   :  { %v225_v8 = vsub.f32 %v2337_v7, %v1850_v6 }
 0x1c8   :  { %v226_v9 = vmul.f32 1.442695, %v225_v8  ;;  %v1915_v8 = vld [vmem:[%s2298_s2 + $0x138] sm:$0xff] }
 0x1ca   :  { %1085 = vpow2.f32 %v226_v9  ;;  %v1921_v9 = vld [vmem:[%s2298_s2 + $0x140] sm:$0xff] }
 0x1d0   :  { %v1086_v10 = vpop.eup %1085 }
 0x1d1   :  { %228 = vadd.xlane.f32.xlu0 %v1086_v10  ;;  %v1927_v10 = vld [vmem:[%s2298_s2 + $0x130] sm:$0xff] }
 0x1f4   :  { %v384_v12 = vpop.f32.mrf.mxu0 }
 0x1f5   :  { %v431_v13 = vadd.f32 %v1036_v11, %v384_v12  ;;  %v404_v35 = vpop.f32.mrf.mxu1  ;;  %v1933_v11 = vld [vmem:[%s2298_s2 + $0x120] sm:$0xff]  ;;  %v1939_v12 = vld [vmem:[%s2298_s2 + $0x128] sm:$0xff] }
 0x1f6   :  { %v451_v47 = vadd.f32 %v404_v35, %v2338_v39 }
 0x1f7   :  { %v1039_v14 = vmul.f32 -1.442695, %v431_v13  ;;  %v1945_v13 = vld [vmem:[%s2298_s2 + $0x118] sm:$0xff] }
 0x1f9   :  { %1087 = vpow2.f32 %v1039_v14  ;;  %v1951_v14 = vld [vmem:[%s2298_s2 + $0x108] sm:$0xff] }
 0x1fa   :  { %v364_v16 = vpop.f32.mrf.mxu3 }
 0x1fb   :  { %v411_v17 = vadd.f32 %v1035_v15, %v364_v16  ;;  %v1957_v15 = vld [vmem:[%s2298_s2 + $0x110] sm:$0xff]  ;;  %v1963_v16 = vld [vmem:[%s2298_s2 + $0x100] sm:$0xff] }
 0x1fd   :  { %v1038_v18 = vmul.f32 -1.442695, %v411_v17  ;;  %v1969_v17 = vld [vmem:[%s2298_s2 + $0xf0] sm:$0xff] }
 0x1ff   :  { %v1088_v19 = vpop.eup %1087  ;;  %1089 = vpow2.f32 %v1038_v18  ;;  %v1975_v18 = vld [vmem:[%s2298_s2 + $0xf8] sm:$0xff] }
 0x200   :  { %v435_v20 = vadd.f32 1.0, %v1088_v19  ;;  %v1981_v19 = vld [vmem:[%s2298_s2 + $0xe8] sm:$0xff] }
 0x202   :  { %1091 = vrcp.f32 %v435_v20  ;;  %v447_v49 = vand.u32 2147483648, %v435_v20  ;;  %vm441_vm5 = vweird.f32 %v435_v20  ;;  %v445_v48 = vand.u32 2147483647, %v435_v20 }
 0x204   :  { %v448_v52 = vor.u32 1.1754944e-38, %v447_v49  ;;  %vm446_vm7 = vcmp.eq.f32.partialorder %v445_v48, 8.507059e+37 }
 0x205   :  { %v1090_v21 = vpop.eup %1089 }
 0x206   :  { %v415_v22 = vadd.f32 1.0, %v1090_v21  ;;  %v1993_v21 = vld [vmem:[%s2298_s2 + $0xe0] sm:$0xff] }
 0x208   :  { %1093 = vrcp.f32 %v415_v22  ;;  %v1092_v23 = vpop.eup %1091  ;;  %v427_v29 = vand.u32 2147483648, %v415_v22  ;;  %v425_v32 = vand.u32 2147483647, %v415_v22  ;;  %vm421_vm1 = vweird.f32 %v415_v22 }
 0x209   :  { %v437_v24 = vmul.f32 %v1092_v23, %v435_v20  ;;  %vm442_vm4 = vweird.f32 %v1092_v23  ;;  %v1987_v20 = vld [vmem:[%s2298_s2 + $0xd8] sm:$0xff] }
 0x20a   :  { %v428_v38 = vor.u32 1.1754944e-38, %v427_v29  ;;  %vm426_vm3 = vcmp.eq.f32.partialorder %v425_v32, 8.507059e+37  ;;  %vm443_vm6 = vmor %vm441_vm5, %vm442_vm4  ;;  %v2097_v32 = vld [vmem:[%s2298_s2 + $0x20] sm:$0xff] }
 0x20b   :  { %v438_v27 = vsub.f32 1.0, %v437_v24  ;;  %v2019_v24 = vld [vmem:[%s2298_s2 + $0xb0] sm:$0xff] }
 0x20d   :  { %v439_v33 = vmul.f32 %v1092_v23, %v438_v27  ;;  %v2058_v27 = vld [vmem:[%s2298_s2 + $0x68] sm:$0xff] }
 0x20e   :  { %v1094_v25 = vpop.eup %1093 }
 0x20f   :  { %v417_v26 = vmul.f32 %v1094_v25, %v415_v22  ;;  %vm422_vm0 = vweird.f32 %v1094_v25  ;;  %v440_v59 = vadd.f32 %v1092_v23, %v439_v33  ;;  %v2000_v22 = vld [vmem:[%s2298_s2 + $0xc0] sm:$0xff]  ;;  %v2110_v33 = vld [vmem:[%s2298_s2 + $0x8] sm:$0xff] }
 0x210   :  { %vm423_vm2 = vmor %vm421_vm1, %vm422_vm0 }
 0x211   :  { %v418_v28 = vsub.f32 1.0, %v417_v26  ;;  %v444_v51 = vsel %vm443_vm6, %v1092_v23, %v440_v59  ;;  %v2006_v23 = vld [vmem:[%s2298_s2 + $0xc8] sm:$0xff]  ;;  %v2045_v26 = vld [vmem:[%s2298_s2 + $0x80] sm:$0xff] }
 0x212   :  { %v449_v56 = vsel %vm446_vm7, %v448_v52, %v444_v51 }
 0x213   :  { %v419_v30 = vmul.f32 %v1094_v25, %v418_v28  ;;  %v455_v61 = vsub.f32 1.0, %v449_v56  ;;  %v457_v53 = vmul.f32 %v449_v56, %v1797_v58  ;;  %v1885_v58 = vld [vmem:[%s2298_s2 + $0x170] sm:$0xff] }
 0x214   :  { %v2071_v28 = vld [vmem:[%s2298_s2 + $0x50] sm:$0xff] }
 0x215   :  { %v420_v36 = vadd.f32 %v1094_v25, %v419_v30  ;;  %v2084_v30 = vld [vmem:[%s2298_s2 + $0x38] sm:$0xff] }
 0x217   :  { %v424_v42 = vsel %vm423_vm2, %v1094_v25, %v420_v36  ;;  %v2032_v25 = vld [vmem:[%s2298_s2 + $0x98] sm:$0xff] }
 0x218   :  { %v429_v63 = vsel %vm426_vm3, %v428_v38, %v424_v42  ;;  %v1041_v42 = vld [vmem:[%s2301_s0 + $0x50] sm:$0xff] }
 0x219   :  { %v452_v62 = vmul.f32 %v451_v47, %v429_v63  ;;  %v1040_v47 = vld [vmem:[%s2301_s0 + $0x48] sm:$0xff] }
 0x21b   :  { %v453_v50 = vadd.f32 %v1037_v57, %v452_v62 }
 0x21d   :  { %1095 = vtanh.f32 %v453_v50 }
 0x223   :  { %v1096_v43 = vpop.eup %1095 }
 0x224   :  { %v456_v41 = vmul.f32 %v1096_v43, %v455_v61 }
 0x226   :  { %v1865_v60 = vadd.f32 %v457_v53, %v456_v41 }
 0x228   :  { %475 = vmatmul.f32.vlgmr.msra.gmra.mxu2 %v1865_v60  ;;  %495 = vmatmul.f32.vlgmr.msra.gmra.mxu3 %v1865_v60 }
 0x229   :  { %515 = vmatmul.f32.vlgmr.msrb.gmra.mxu0 %v1865_v60  ;;  %723 = vmatpush.msra.mxu2 %v1873_v54 }
 0x22a   :  { %795 = vmatpush.msra.mxu3 %v1879_v55  ;;  %815 = vmatpush.msrb.mxu0 %v1885_v58 }
 0x22b   :  { %724 = vmatpush.msra.mxu2 %v1891_v1 }
 0x22c   :  { %796 = vmatpush.msra.mxu3 %v1897_v2  ;;  %816 = vmatpush.msrb.mxu0 %v1903_v4 }
 0x22d   :  { %725 = vmatpush.msra.mxu2 %v1909_v5 }
 0x22e   :  { %797 = vmatpush.msra.mxu3 %v1915_v8  ;;  %817 = vmatpush.msrb.mxu0 %v1921_v9 }
 0x22f   :  { %726 = vmatpush.msra.mxu2 %v1927_v10 }
 0x230   :  { %798 = vmatpush.msra.mxu3 %v1933_v11  ;;  %818 = vmatpush.msrb.mxu0 %v1939_v12 }
 0x231   :  { %727 = vmatpush.msra.mxu2 %v1945_v13 }
 0x232   :  { %799 = vmatpush.msra.mxu3 %v1951_v14  ;;  %819 = vmatpush.msrb.mxu0 %v1957_v15 }
 0x233   :  { %728 = vmatpush.msra.mxu2 %v1963_v16 }
 0x234   :  { %800 = vmatpush.msra.mxu3 %v1969_v17  ;;  %820 = vmatpush.msrb.mxu0 %v1975_v18 }
 0x235   :  { %729 = vmatpush.msra.mxu2 %v1981_v19 }
 0x236   :  { %801 = vmatpush.msra.mxu3 %v1987_v20  ;;  %821 = vmatpush.msrb.mxu0 %v1993_v21 }
 0x237   :  { %730 = vmatpush.msra.mxu2 %v1424_v31  ;;  %v2013_v31 = vld [vmem:[%s2298_s2 + $0xa8] sm:$0xff] }
 0x238   :  { %802 = vmatpush.msra.mxu3 %v2000_v22  ;;  %822 = vmatpush.msrb.mxu0 %v2006_v23 }
 0x239   :  { %731 = vmatpush.msra.mxu2 %v1442_v34  ;;  %v2026_v34 = vld [vmem:[%s2298_s2 + $0x90] sm:$0xff] }
 0x23a   :  { %803 = vmatpush.msra.mxu3 %v2013_v31  ;;  %823 = vmatpush.msrb.mxu0 %v2019_v24 }
 0x23b   :  { %732 = vmatpush.msra.mxu2 %v1460_v37  ;;  %v2039_v37 = vld [vmem:[%s2298_s2 + $0x78] sm:$0xff] }
 0x23c   :  { %804 = vmatpush.msra.mxu3 %v2026_v34  ;;  %824 = vmatpush.msrb.mxu0 %v2032_v25 }
 0x23d   :  { %733 = vmatpush.msra.mxu2 %v1478_v40  ;;  %v2052_v40 = vld [vmem:[%s2298_s2 + $0x60] sm:$0xff] }
 0x23e   :  { %805 = vmatpush.msra.mxu3 %v2039_v37  ;;  %825 = vmatpush.msrb.mxu0 %v2045_v26 }
 0x23f   :  { %734 = vmatpush.msra.mxu2 %v1502_v44  ;;  %v2065_v44 = vld [vmem:[%s2298_s2 + $0x48] sm:$0xff] }
 0x240   :  { %806 = vmatpush.msra.mxu3 %v2052_v40  ;;  %826 = vmatpush.msrb.mxu0 %v2058_v27 }
 0x241   :  { %735 = vmatpush.msra.mxu2 %v1511_v45  ;;  %v2078_v45 = vld [vmem:[%s2298_s2 + $0x30] sm:$0xff] }
 0x242   :  { %807 = vmatpush.msra.mxu3 %v2065_v44  ;;  %827 = vmatpush.msrb.mxu0 %v2071_v28 }
 0x243   :  { %736 = vmatpush.msra.mxu2 %v1518_v46  ;;  %v2091_v46 = vld [vmem:[%s2298_s2 + $0x18] sm:$0xff] }
 0x244   :  { %v229_v29 = vpop.xlane.xlu0 %228  ;;  %808 = vmatpush.msra.mxu3 %v2078_v45  ;;  %828 = vmatpush.msrb.mxu0 %v2084_v30 }
 0x245   :  { %1097 = vlog2.f32 %v229_v29  ;;  %737 = vmatpush.msra.mxu2 %v2331_v0  ;;  %v2104_v0 = vld [vmem:[%s2298_s2] sm:$0xff] }
 0x246   :  { %809 = vmatpush.msra.mxu3 %v2091_v46  ;;  %829 = vmatpush.msrb.mxu0 %v2097_v32 }
 0x247   :  { %738 = vmatpush.msra.mxu2 %v2334_v3 }
 0x248   :  { %810 = vmatpush.msra.mxu3 %v2104_v0  ;;  %830 = vmatpush.msrb.mxu0 %v2110_v33 }
 0x24b   :  { %v1098_v35 = vpop.eup %1097 }
 0x24c   :  { %v231_v36 = vmul.f32 0.6931472, %v1098_v35 }
 0x24e   :  { %v232_v38 = vadd.f32 %v231_v36, %v1850_v6 }
 0x250   :  { %v233_v3 = vsub.f32 %v2337_v7, %v232_v38 }
 0x252   :  { %234 = vst [vmem:[%s2304_s6] sm:$0xff] %v233_v3 }
 0x2a6   :  { %v516_v38 = vpop.f32.mrf.mxu0 }
 0x2ab   :  { %v476_v63 = vpop.f32.mrf.mxu2  ;;  %v496_v57 = vpop.f32.mrf.mxu3 }
 0x2ac   :  { %v523_v59 = vadd.f32 %v1040_v47, %v476_v63  ;;  %v543_v49 = vadd.f32 %v1041_v42, %v496_v57  ;;  %v563_v63 = vadd.f32 %v516_v38, %v2338_v39  ;;  %v1047_v38 = vld [vmem:[%s2301_s0 + $0x70] sm:$0xff] }
 0x2ae   :  { %v1043_v62 = vmul.f32 -1.442695, %v523_v59  ;;  %v1044_v6 = vmul.f32 -1.442695, %v543_v49  ;;  %v1042_v49 = vld [vmem:[%s2301_s0 + $0x58] sm:$0xff] }
 0x2b0   :  { %1099 = vpow2.f32 %v1043_v62 }
 0x2b1   :  { %1101 = vpow2.f32 %v1044_v6 }
 0x2b6   :  { %v1100_v7 = vpop.eup %1099 }
 0x2b7   :  { %v1102_v48 = vpop.eup %1101  ;;  %v527_v50 = vadd.f32 1.0, %v1100_v7 }
 0x2b8   :  { %v547_v51 = vadd.f32 1.0, %v1102_v48 }
 0x2b9   :  { %1103 = vrcp.f32 %v527_v50  ;;  %v539_v53 = vand.u32 2147483648, %v527_v50  ;;  %v537_v36 = vand.u32 2147483647, %v527_v50  ;;  %vm533_vm9 = vweird.f32 %v527_v50 }
 0x2ba   :  { %1105 = vrcp.f32 %v547_v51  ;;  %v559_v6 = vand.u32 2147483648, %v547_v51  ;;  %vm553_vm13 = vweird.f32 %v547_v51  ;;  %v557_v48 = vand.u32 2147483647, %v547_v51 }
 0x2bb   :  { %v540_v42 = vor.u32 1.1754944e-38, %v539_v53  ;;  %vm538_vm11 = vcmp.eq.f32.partialorder %v537_v36, 8.507059e+37 }
 0x2bc   :  { %vm558_vm15 = vcmp.eq.f32.partialorder %v557_v48, 8.507059e+37 }
 0x2bf   :  { %v1104_v52 = vpop.eup %1103 }
 0x2c0   :  { %v1106_v56 = vpop.eup %1105  ;;  %v529_v61 = vmul.f32 %v1104_v52, %v527_v50  ;;  %vm534_vm8 = vweird.f32 %v1104_v52 }
 0x2c1   :  { %v549_v43 = vmul.f32 %v1106_v56, %v547_v51  ;;  %vm535_vm10 = vmor %vm533_vm9, %vm534_vm8  ;;  %vm554_vm12 = vweird.f32 %v1106_v56 }
 0x2c2   :  { %v530_v41 = vsub.f32 1.0, %v529_v61  ;;  %vm555_vm14 = vmor %vm553_vm13, %vm554_vm12 }
 0x2c3   :  { %v550_v29 = vsub.f32 1.0, %v549_v43  ;;  %v560_v43 = vor.u32 1.1754944e-38, %v559_v6 }
 0x2c4   :  { %v531_v35 = vmul.f32 %v1104_v52, %v530_v41 }
 0x2c5   :  { %v551_v3 = vmul.f32 %v1106_v56, %v550_v29 }
 0x2c6   :  { %v532_v47 = vadd.f32 %v1104_v52, %v531_v35 }
 0x2c7   :  { %v552_v62 = vadd.f32 %v1106_v56, %v551_v3 }
 0x2c8   :  { %v536_v57 = vsel %vm535_vm10, %v1104_v52, %v532_v47 }
 0x2c9   :  { %v541_v59 = vsel %vm538_vm11, %v540_v42, %v536_v57  ;;  %v556_v50 = vsel %vm555_vm14, %v1106_v56, %v552_v62 }
 0x2ca   :  { %v564_v7 = vmul.f32 %v563_v63, %v541_v59  ;;  %v561_v41 = vsel %vm558_vm15, %v560_v43, %v556_v50 }
 0x2cb   :  { %v567_v52 = vsub.f32 1.0, %v561_v41  ;;  %v569_v35 = vmul.f32 %v561_v41, %v1865_v60  ;;  %v2158_v60 = vld [vmem:[%s2298_s2 + $0xd0] sm:$0xff] }
 0x2cc   :  { %v565_v61 = vadd.f32 %v1042_v49, %v564_v7 }
 0x2ce   :  { %1107 = vtanh.f32 %v565_v61 }
 0x2d4   :  { %v1108_v53 = vpop.eup %1107 }
 0x2d5   :  { %v568_v29 = vmul.f32 %v1108_v53, %v567_v52 }
 0x2d7   :  { %v2129_v36 = vadd.f32 %v569_v35, %v568_v29 }
 0x2d9   :  { %587 = vmatmul.f32.vlgmr.msrb.gmra.mxu1 %v2129_v36  ;;  %607 = vmatmul.f32.vlgmr.msrb.gmra.mxu2 %v2129_v36 }
 0x2da   :  { %627 = vmatmul.f32.vlgmr.msrb.gmra.mxu3 %v2129_v36  ;;  %835 = vmatpush.msrb.mxu1 %v1873_v54 }
 0x2db   :  { %907 = vmatpush.msrb.mxu2 %v1879_v55  ;;  %927 = vmatpush.msrb.mxu3 %v1885_v58  ;;  %v2166_v55 = vld [vmem:[%s2298_s2 + $0xb8] sm:$0xff]  ;;  %v2174_v58 = vld [vmem:[%s2298_s2 + $0xa0] sm:$0xff] }
 0x2dc   :  { %836 = vmatpush.msrb.mxu1 %v1891_v1 }
 0x2dd   :  { %908 = vmatpush.msrb.mxu2 %v1897_v2  ;;  %928 = vmatpush.msrb.mxu3 %v1903_v4  ;;  %v2182_v2 = vld [vmem:[%s2298_s2 + $0x88] sm:$0xff]  ;;  %v2190_v4 = vld [vmem:[%s2298_s2 + $0x70] sm:$0xff] }
 0x2de   :  { %837 = vmatpush.msrb.mxu1 %v1909_v5 }
 0x2df   :  { %909 = vmatpush.msrb.mxu2 %v1915_v8  ;;  %929 = vmatpush.msrb.mxu3 %v1921_v9  ;;  %v2198_v8 = vld [vmem:[%s2298_s2 + $0x58] sm:$0xff]  ;;  %v2206_v9 = vld [vmem:[%s2298_s2 + $0x40] sm:$0xff] }
 0x2e0   :  { %838 = vmatpush.msrb.mxu1 %v1927_v10 }
 0x2e1   :  { %910 = vmatpush.msrb.mxu2 %v1933_v11  ;;  %930 = vmatpush.msrb.mxu3 %v1939_v12  ;;  %v2214_v11 = vld [vmem:[%s2298_s2 + $0x28] sm:$0xff]  ;;  %v2222_v12 = vld [vmem:[%s2298_s2 + $0x10] sm:$0xff] }
 0x2e2   :  { %839 = vmatpush.msrb.mxu1 %v1945_v13 }
 0x2e3   :  { %911 = vmatpush.msrb.mxu2 %v1951_v14  ;;  %931 = vmatpush.msrb.mxu3 %v1957_v15  ;;  %v1045_v14 = vld [vmem:[%s2301_s0 + $0x60] sm:$0xff] }
 0x2e4   :  { %840 = vmatpush.msrb.mxu1 %v1963_v16 }
 0x2e5   :  { %912 = vmatpush.msrb.mxu2 %v1969_v17  ;;  %932 = vmatpush.msrb.mxu3 %v1975_v18 }
 0x2e6   :  { %841 = vmatpush.msrb.mxu1 %v1981_v19 }
 0x2e7   :  { %913 = vmatpush.msrb.mxu2 %v1987_v20  ;;  %933 = vmatpush.msrb.mxu3 %v1993_v21  ;;  %v1046_v20 = vld [vmem:[%s2301_s0 + $0x68] sm:$0xff] }
 0x2e8   :  { %842 = vmatpush.msrb.mxu1 %v2158_v60 }
 0x2e9   :  { %914 = vmatpush.msrb.mxu2 %v2000_v22  ;;  %934 = vmatpush.msrb.mxu3 %v2006_v23 }
 0x2ea   :  { %843 = vmatpush.msrb.mxu1 %v2166_v55 }
 0x2eb   :  { %915 = vmatpush.msrb.mxu2 %v2013_v31  ;;  %935 = vmatpush.msrb.mxu3 %v2019_v24 }
 0x2ec   :  { %844 = vmatpush.msrb.mxu1 %v2174_v58 }
 0x2ed   :  { %916 = vmatpush.msrb.mxu2 %v2026_v34  ;;  %936 = vmatpush.msrb.mxu3 %v2032_v25 }
 0x2ee   :  { %845 = vmatpush.msrb.mxu1 %v2182_v2 }
 0x2ef   :  { %917 = vmatpush.msrb.mxu2 %v2039_v37  ;;  %937 = vmatpush.msrb.mxu3 %v2045_v26 }
 0x2f0   :  { %846 = vmatpush.msrb.mxu1 %v2190_v4 }
 0x2f1   :  { %918 = vmatpush.msrb.mxu2 %v2052_v40  ;;  %938 = vmatpush.msrb.mxu3 %v2058_v27 }
 0x2f2   :  { %847 = vmatpush.msrb.mxu1 %v2198_v8 }
 0x2f3   :  { %919 = vmatpush.msrb.mxu2 %v2065_v44  ;;  %939 = vmatpush.msrb.mxu3 %v2071_v28 }
 0x2f4   :  { %848 = vmatpush.msrb.mxu1 %v2206_v9 }
 0x2f5   :  { %920 = vmatpush.msrb.mxu2 %v2078_v45  ;;  %940 = vmatpush.msrb.mxu3 %v2084_v30 }
 0x2f6   :  { %849 = vmatpush.msrb.mxu1 %v2214_v11 }
 0x2f7   :  { %921 = vmatpush.msrb.mxu2 %v2091_v46  ;;  %941 = vmatpush.msrb.mxu3 %v2097_v32 }
 0x2f8   :  { %850 = vmatpush.msrb.mxu1 %v2222_v12 }
 0x2f9   :  { %922 = vmatpush.msrb.mxu2 %v2104_v0  ;;  %942 = vmatpush.msrb.mxu3 %v2110_v33 }
 0x356   :  { %v588_v15 = vpop.f32.mrf.mxu1 }
 0x357   :  { %v635_v17 = vadd.f32 %v1045_v14, %v588_v15 }
 0x359   :  { %v1048_v18 = vmul.f32 -1.442695, %v635_v17 }
 0x35b   :  { %1109 = vpow2.f32 %v1048_v18 }
 0x35c   :  { %v608_v21 = vpop.f32.mrf.mxu2 }
 0x35d   :  { %v655_v22 = vadd.f32 %v1046_v20, %v608_v21  ;;  %v628_v30 = vpop.f32.mrf.mxu3  ;;  %v2268_v20 = vld [vmem:[%s2302_s3] sm:$0xff] }
 0x35e   :  { %v675_v56 = vadd.f32 %v628_v30, %v2338_v39 }
 0x35f   :  { %v1049_v23 = vmul.f32 -1.442695, %v655_v22  ;;  %v1052_v22 = vld [vmem:[%s2301_s0 + $0x88] sm:$0xff] }
 0x361   :  { %v1110_v31 = vpop.eup %1109  ;;  %1111 = vpow2.f32 %v1049_v23 }
 0x362   :  { %v639_v24 = vadd.f32 1.0, %v1110_v31 }
 0x364   :  { %1113 = vrcp.f32 %v639_v24  ;;  %v651_v27 = vand.u32 2147483648, %v639_v24  ;;  %v649_v28 = vand.u32 2147483647, %v639_v24  ;;  %vm645_vm1 = vweird.f32 %v639_v24 }
 0x366   :  { %v652_v0 = vor.u32 1.1754944e-38, %v651_v27  ;;  %vm650_vm3 = vcmp.eq.f32.partialorder %v649_v28, 8.507059e+37 }
 0x367   :  { %v1112_v34 = vpop.eup %1111 }
 0x368   :  { %v659_v25 = vadd.f32 1.0, %v1112_v34 }
 0x36a   :  { %v1114_v37 = vpop.eup %1113  ;;  %1115 = vrcp.f32 %v659_v25  ;;  %v671_v63 = vand.u32 2147483648, %v659_v25  ;;  %v669_v57 = vand.u32 2147483647, %v659_v25  ;;  %vm665_vm5 = vweird.f32 %v659_v25 }
 0x36b   :  { %v641_v26 = vmul.f32 %v1114_v37, %v639_v24  ;;  %vm646_vm0 = vweird.f32 %v1114_v37 }
 0x36c   :  { %vm647_vm2 = vmor %vm645_vm1, %vm646_vm0  ;;  %v672_v6 = vor.u32 1.1754944e-38, %v671_v63  ;;  %vm670_vm7 = vcmp.eq.f32.partialorder %v669_v57, 8.507059e+37 }
 0x36d   :  { %v642_v40 = vsub.f32 1.0, %v641_v26 }
 0x36f   :  { %v643_v44 = vmul.f32 %v1114_v37, %v642_v40 }
 0x370   :  { %v1116_v45 = vpop.eup %1115 }
 0x371   :  { %v661_v46 = vmul.f32 %v1116_v45, %v659_v25  ;;  %v644_v32 = vadd.f32 %v1114_v37, %v643_v44  ;;  %vm666_vm4 = vweird.f32 %v1116_v45 }
 0x372   :  { %vm667_vm6 = vmor %vm665_vm5, %vm666_vm4 }
 0x373   :  { %v662_v33 = vsub.f32 1.0, %v661_v46  ;;  %v648_v51 = vsel %vm647_vm2, %v1114_v37, %v644_v32  ;;  %v1056_v32 = vld [vmem:[%s2301_s0 + $0x98] sm:$0xff] }
 0x374   :  { %v653_v3 = vsel %vm650_vm3, %v652_v0, %v648_v51 }
 0x375   :  { %v663_v47 = vmul.f32 %v1116_v45, %v662_v33  ;;  %v676_v42 = vmul.f32 %v675_v56, %v653_v3  ;;  %v1055_v56 = vld [vmem:[%s2301_s0 + $0x90] sm:$0xff] }
 0x377   :  { %v677_v59 = vadd.f32 %v1047_v38, %v676_v42  ;;  %v664_v49 = vadd.f32 %v1116_v45, %v663_v47 }
 0x379   :  { %1117 = vtanh.f32 %v677_v59  ;;  %v668_v62 = vsel %vm667_vm6, %v1116_v45, %v664_v49 }
 0x37a   :  { %v673_v7 = vsel %vm670_vm7, %v672_v6, %v668_v62 }
 0x37b   :  { %v679_v39 = vsub.f32 1.0, %v673_v7  ;;  %v681_v50 = vmul.f32 %v673_v7, %v2129_v36 }
 0x37f   :  { %v1118_v48 = vpop.eup %1117 }
 0x380   :  { %v680_v61 = vmul.f32 %v1118_v48, %v679_v39 }
 0x382   :  { %v2238_v43 = vadd.f32 %v681_v50, %v680_v61 }
 0x384   :  { %699 = vmatmul.f32.vlgmr.msra.gmra.mxu0 %v2238_v43  ;;  %719 = vmatmul.f32.vlgmr.msra.gmra.mxu1 %v2238_v43 }
 0x385   :  { %739 = vmatmul.f32.vlgmr.msra.gmra.mxu2 %v2238_v43  ;;  %947 = vmatpush.msra.mxu0 %v1873_v54  ;;  %v1050_v54 = vld [vmem:[%s2301_s0 + $0x78] sm:$0xff] }
 0x387   :  { %948 = vmatpush.msra.mxu0 %v1891_v1  ;;  %v1051_v1 = vld [vmem:[%s2301_s0 + $0x80] sm:$0xff] }
 0x389   :  { %949 = vmatpush.msra.mxu0 %v1909_v5 }
 0x38b   :  { %950 = vmatpush.msra.mxu0 %v1927_v10 }
 0x38d   :  { %951 = vmatpush.msra.mxu0 %v1945_v13 }
 0x38f   :  { %952 = vmatpush.msra.mxu0 %v1963_v16 }
 0x391   :  { %953 = vmatpush.msra.mxu0 %v1981_v19 }
 0x393   :  { %954 = vmatpush.msra.mxu0 %v2158_v60 }
 0x395   :  { %955 = vmatpush.msra.mxu0 %v2166_v55 }
 0x397   :  { %956 = vmatpush.msra.mxu0 %v2174_v58 }
 0x399   :  { %957 = vmatpush.msra.mxu0 %v2182_v2 }
 0x39b   :  { %958 = vmatpush.msra.mxu0 %v2190_v4 }
 0x39d   :  { %959 = vmatpush.msra.mxu0 %v2198_v8 }
 0x39f   :  { %960 = vmatpush.msra.mxu0 %v2206_v9 }
 0x3a1   :  { %961 = vmatpush.msra.mxu0 %v2214_v11 }
 0x3a3   :  { %962 = vmatpush.msra.mxu0 %v2222_v12 }
 0x401   :  { %v700_v5 = vpop.f32.mrf.mxu0  ;;  %v720_v10 = vpop.f32.mrf.mxu1 }
 0x402   :  { %v747_v13 = vadd.f32 %v1050_v54, %v700_v5  ;;  %v767_v16 = vadd.f32 %v1051_v1, %v720_v10 }
 0x404   :  { %v1053_v19 = vmul.f32 -1.442695, %v747_v13  ;;  %v1054_v41 = vmul.f32 -1.442695, %v767_v16 }
 0x406   :  { %1119 = vpow2.f32 %v1053_v19 }
 0x407   :  { %1121 = vpow2.f32 %v1054_v41  ;;  %v1057_v41 = vld [vmem:[%s2301_s0 + $0xa0] sm:$0xff] }
 0x408   :  { %v740_v14 = vpop.f32.mrf.mxu2 }
 0x409   :  { %v787_v21 = vadd.f32 %v2268_v20, %v740_v14  ;;  %v1061_v14 = vld [vmem:[%s2301_s0 + $0xb0] sm:$0xff] }
 0x40c   :  { %v1120_v52 = vpop.eup %1119 }
 0x40d   :  { %v1122_v53 = vpop.eup %1121  ;;  %v751_v29 = vadd.f32 1.0, %v1120_v52 }
 0x40e   :  { %v771_v35 = vadd.f32 1.0, %v1122_v53 }
 0x40f   :  { %1123 = vrcp.f32 %v751_v29  ;;  %v763_v8 = vand.u32 2147483648, %v751_v29  ;;  %v761_v11 = vand.u32 2147483647, %v751_v29  ;;  %vm757_vm9 = vweird.f32 %v751_v29 }
 0x410   :  { %1125 = vrcp.f32 %v771_v35  ;;  %v783_v34 = vand.u32 2147483648, %v771_v35  ;;  %vm777_vm13 = vweird.f32 %v771_v35  ;;  %v781_v25 = vand.u32 2147483647, %v771_v35 }
 0x411   :  { %v764_v17 = vor.u32 1.1754944e-38, %v763_v8  ;;  %vm762_vm11 = vcmp.eq.f32.partialorder %v761_v11, 8.507059e+37 }
 0x412   :  { %v784_v40 = vor.u32 1.1754944e-38, %v783_v34  ;;  %vm782_vm15 = vcmp.eq.f32.partialorder %v781_v25, 8.507059e+37 }
 0x415   :  { %v1124_v36 = vpop.eup %1123 }
 0x416   :  { %v1126_v60 = vpop.eup %1125  ;;  %v753_v55 = vmul.f32 %v1124_v36, %v751_v29  ;;  %vm758_vm8 = vweird.f32 %v1124_v36 }
 0x417   :  { %v773_v58 = vmul.f32 %v1126_v60, %v771_v35  ;;  %vm759_vm10 = vmor %vm757_vm9, %vm758_vm8  ;;  %vm778_vm12 = vweird.f32 %v1126_v60 }
 0x418   :  { %v754_v2 = vsub.f32 1.0, %v753_v55  ;;  %vm779_vm14 = vmor %vm777_vm13, %vm778_vm12 }
 0x419   :  { %v774_v4 = vsub.f32 1.0, %v773_v58 }
 0x41a   :  { %v755_v9 = vmul.f32 %v1124_v36, %v754_v2 }
 0x41b   :  { %v775_v12 = vmul.f32 %v1126_v60, %v774_v4 }
 0x41c   :  { %v756_v15 = vadd.f32 %v1124_v36, %v755_v9 }
 0x41d   :  { %v776_v31 = vadd.f32 %v1126_v60, %v775_v12  ;;  %v1060_v12 = vld [vmem:[%s2301_s0 + $0xa8] sm:$0xff] }
 0x41e   :  { %v760_v18 = vsel %vm759_vm10, %v1124_v36, %v756_v15 }
 0x41f   :  { %v765_v23 = vsel %vm762_vm11, %v764_v17, %v760_v18  ;;  %v780_v26 = vsel %vm779_vm14, %v1126_v60, %v776_v31 }
 0x420   :  { %v788_v24 = vmul.f32 %v787_v21, %v765_v23  ;;  %v785_v27 = vsel %vm782_vm15, %v784_v40, %v780_v26 }
 0x421   :  { %v791_v44 = vsub.f32 1.0, %v785_v27  ;;  %v793_v30 = vmul.f32 %v785_v27, %v2238_v43 }
 0x422   :  { %v789_v37 = vadd.f32 %v1052_v22, %v788_v24 }
 0x424   :  { %1127 = vtanh.f32 %v789_v37 }
 0x42a   :  { %v1128_v28 = vpop.eup %1127 }
 0x42b   :  { %v792_v45 = vmul.f32 %v1128_v28, %v791_v44 }
 0x42d   :  { %v794_v46 = vadd.f32 %v793_v30, %v792_v45 }
 0x42f   :  { %811 = vmatmul.f32.vlgmr.msra.gmra.mxu3 %v794_v46  ;;  %831 = vmatmul.f32.vlgmr.msrb.gmra.mxu0 %v794_v46 }
 0x430   :  { %851 = vmatmul.f32.vlgmr.msrb.gmra.mxu1 %v794_v46 }
 0x4ac   :  { %v832_v0 = vpop.f32.mrf.mxu0 }
 0x4ad   :  { %v879_v33 = vadd.f32 %v1056_v32, %v832_v0  ;;  %v852_v1 = vpop.f32.mrf.mxu1 }
 0x4ae   :  { %v899_v13 = vadd.f32 %v2268_v20, %v852_v1 }
 0x4af   :  { %v1059_v51 = vmul.f32 -1.442695, %v879_v33 }
 0x4b1   :  { %1129 = vpow2.f32 %v1059_v51 }
 0x4b2   :  { %v812_v38 = vpop.f32.mrf.mxu3 }
 0x4b3   :  { %v859_v3 = vadd.f32 %v1055_v56, %v812_v38 }
 0x4b5   :  { %v1058_v47 = vmul.f32 -1.442695, %v859_v3  ;;  %v1062_v3 = vld [vmem:[%s2301_s0 + $0xb8] sm:$0xff] }
 0x4b7   :  { %v1130_v42 = vpop.eup %1129  ;;  %1131 = vpow2.f32 %v1058_v47 }
 0x4b8   :  { %v883_v63 = vadd.f32 1.0, %v1130_v42 }
 0x4ba   :  { %1133 = vrcp.f32 %v883_v63  ;;  %v895_v53 = vand.u32 2147483648, %v883_v63  ;;  %vm889_vm5 = vweird.f32 %v883_v63  ;;  %v893_v35 = vand.u32 2147483647, %v883_v63 }
 0x4bc   :  { %v896_v55 = vor.u32 1.1754944e-38, %v895_v53  ;;  %vm894_vm7 = vcmp.eq.f32.partialorder %v893_v35, 8.507059e+37 }
 0x4bd   :  { %v1132_v57 = vpop.eup %1131 }
 0x4be   :  { %v863_v59 = vadd.f32 1.0, %v1132_v57 }
 0x4c0   :  { %1135 = vrcp.f32 %v863_v59  ;;  %v1134_v49 = vpop.eup %1133  ;;  %v875_v61 = vand.u32 2147483648, %v863_v59  ;;  %v873_v43 = vand.u32 2147483647, %v863_v59  ;;  %vm869_vm1 = vweird.f32 %v863_v59 }
 0x4c1   :  { %v885_v62 = vmul.f32 %v1134_v49, %v883_v63  ;;  %vm890_vm4 = vweird.f32 %v1134_v49 }
 0x4c2   :  { %v876_v10 = vor.u32 1.1754944e-38, %v875_v61  ;;  %vm874_vm3 = vcmp.eq.f32.partialorder %v873_v43, 8.507059e+37  ;;  %vm891_vm6 = vmor %vm889_vm5, %vm890_vm4 }
 0x4c3   :  { %v886_v39 = vsub.f32 1.0, %v885_v62 }
 0x4c5   :  { %v887_v54 = vmul.f32 %v1134_v49, %v886_v39 }
 0x4c6   :  { %v1136_v6 = vpop.eup %1135 }
 0x4c7   :  { %v865_v7 = vmul.f32 %v1136_v6, %v863_v59  ;;  %vm870_vm0 = vweird.f32 %v1136_v6  ;;  %v888_v52 = vadd.f32 %v1134_v49, %v887_v54 }
 0x4c8   :  { %vm871_vm2 = vmor %vm869_vm1, %vm870_vm0 }
 0x4c9   :  { %v866_v48 = vsub.f32 1.0, %v865_v7  ;;  %v892_v60 = vsel %vm891_vm6, %v1134_v49, %v888_v52 }
 0x4ca   :  { %v897_v58 = vsel %vm894_vm7, %v896_v55, %v892_v60 }
 0x4cb   :  { %v867_v50 = vmul.f32 %v1136_v6, %v866_v48  ;;  %v903_v2 = vsub.f32 1.0, %v897_v58  ;;  %v905_v9 = vmul.f32 %v897_v58, %v794_v46 }
 0x4cd   :  { %v868_v5 = vadd.f32 %v1136_v6, %v867_v50 }
 0x4cf   :  { %v872_v16 = vsel %vm871_vm2, %v1136_v6, %v868_v5 }
 0x4d0   :  { %v877_v19 = vsel %vm874_vm3, %v876_v10, %v872_v16 }
 0x4d1   :  { %v900_v29 = vmul.f32 %v899_v13, %v877_v19 }
 0x4d3   :  { %v901_v36 = vadd.f32 %v1057_v41, %v900_v29 }
 0x4d5   :  { %1137 = vtanh.f32 %v901_v36 }
 0x4db   :  { %v1138_v4 = vpop.eup %1137 }
 0x4dc   :  { %v904_v8 = vmul.f32 %v1138_v4, %v903_v2 }
 0x4de   :  { %v906_v11 = vadd.f32 %v905_v9, %v904_v8 }
 0x4e0   :  { %923 = vmatmul.f32.vlgmr.msrb.gmra.mxu2 %v906_v11  ;;  %943 = vmatmul.f32.vlgmr.msrb.gmra.mxu3 %v906_v11 }
 0x4e1   :  { %963 = vmatmul.f32.vlgmr.msra.gmra.mxu0 %v906_v11 }
 0x55e   :  { %v964_v32 = vpop.f32.mrf.mxu0 }
 0x55f   :  { %v1011_v56 = vadd.f32 %v2268_v20, %v964_v32 }
 0x563   :  { %v924_v15 = vpop.f32.mrf.mxu2  ;;  %v944_v17 = vpop.f32.mrf.mxu3 }
 0x564   :  { %v971_v18 = vadd.f32 %v1060_v12, %v924_v15  ;;  %v991_v21 = vadd.f32 %v1061_v14, %v944_v17 }
 0x566   :  { %v1063_v22 = vmul.f32 -1.442695, %v971_v18  ;;  %v1064_v23 = vmul.f32 -1.442695, %v991_v21 }
 0x568   :  { %1139 = vpow2.f32 %v1063_v22 }
 0x569   :  { %1141 = vpow2.f32 %v1064_v23 }
 0x56e   :  { %v1140_v31 = vpop.eup %1139 }
 0x56f   :  { %v1142_v24 = vpop.eup %1141  ;;  %v975_v34 = vadd.f32 1.0, %v1140_v31 }
 0x570   :  { %v995_v25 = vadd.f32 1.0, %v1142_v24 }
 0x571   :  { %1143 = vrcp.f32 %v975_v34  ;;  %v987_v28 = vand.u32 2147483648, %v975_v34  ;;  %v985_v46 = vand.u32 2147483647, %v975_v34  ;;  %vm981_vm9 = vweird.f32 %v975_v34 }
 0x572   :  { %1145 = vrcp.f32 %v995_v25  ;;  %v1007_v57 = vand.u32 2147483648, %v995_v25  ;;  %vm1001_vm13 = vweird.f32 %v995_v25  ;;  %v1005_v59 = vand.u32 2147483647, %v995_v25 }
 0x573   :  { %v988_v51 = vor.u32 1.1754944e-38, %v987_v28  ;;  %vm986_vm11 = vcmp.eq.f32.partialorder %v985_v46, 8.507059e+37 }
 0x574   :  { %v1008_v6 = vor.u32 1.1754944e-38, %v1007_v57  ;;  %vm1006_vm15 = vcmp.eq.f32.partialorder %v1005_v59, 8.507059e+37 }
 0x577   :  { %v1144_v37 = vpop.eup %1143 }
 0x578   :  { %v1146_v26 = vpop.eup %1145  ;;  %v977_v40 = vmul.f32 %v1144_v37, %v975_v34  ;;  %vm982_vm8 = vweird.f32 %v1144_v37 }
 0x579   :  { %v997_v27 = vmul.f32 %v1146_v26, %v995_v25  ;;  %vm983_vm10 = vmor %vm981_vm9, %vm982_vm8  ;;  %vm1002_vm12 = vweird.f32 %v1146_v26 }
 0x57a   :  { %v978_v44 = vsub.f32 1.0, %v977_v40  ;;  %vm1003_vm14 = vmor %vm1001_vm13, %vm1002_vm12 }
 0x57b   :  { %v998_v45 = vsub.f32 1.0, %v997_v27 }
 0x57c   :  { %v979_v30 = vmul.f32 %v1144_v37, %v978_v44 }
 0x57d   :  { %v999_v0 = vmul.f32 %v1146_v26, %v998_v45 }
 0x57e   :  { %v980_v33 = vadd.f32 %v1144_v37, %v979_v30 }
 0x57f   :  { %v1000_v42 = vadd.f32 %v1146_v26, %v999_v0 }
 0x580   :  { %v984_v38 = vsel %vm983_vm10, %v1144_v37, %v980_v33 }
 0x581   :  { %v989_v47 = vsel %vm986_vm11, %v988_v51, %v984_v38  ;;  %v1004_v62 = vsel %vm1003_vm14, %v1146_v26, %v1000_v42 }
 0x582   :  { %v1012_v63 = vmul.f32 %v1011_v56, %v989_v47  ;;  %v1009_v20 = vsel %vm1006_vm15, %v1008_v6, %v1004_v62 }
 0x583   :  { %v1015_v7 = vsub.f32 1.0, %v1009_v20  ;;  %v1017_v61 = vmul.f32 %v1009_v20, %v906_v11 }
 0x584   :  { %v1013_v49 = vadd.f32 %v1062_v3, %v1012_v63 }
 0x586   :  { %1147 = vtanh.f32 %v1013_v49 }
 0x58c   :  { %v1148_v39 = vpop.eup %1147 }
 0x58d   :  { %v1016_v48 = vmul.f32 %v1148_v39, %v1015_v7 }
 0x58f   :  { %v1018_v50 = vadd.f32 %v1017_v61, %v1016_v48 }
 0x591   :  { %1019 = vst [vmem:[%s2305_s7] sm:$0xff] %v1018_v50 }

</bundles_post_ra>
